<compile_context>
chip_gen: v6e
topology: v6e:2x2x1
jax: 0.10.0
libtpu: 0.0.40
codegen_flags: <defaults>
</compile_context>

<pallas_src>
import math

import jax
import jax.numpy as jnp
from jax.experimental import pallas as pl
from jax.experimental.pallas import tpu as pltpu

# ---- problem sizes (small, consistent with the module) ----
B = 2          # batch
T = 8          # target sequence length
S = 8          # memory (source) sequence length
D_MODEL = 32   # d_model
NUM_HEADS = 4
D_K = D_MODEL // NUM_HEADS
D_FF = 64
LN_EPS = 1e-5

# ---- parameter-slab layout (one lane-dense (64, 384) f32 ref) ----
# Weight column offsets (rows 0..in_dim-1 hold the weight matrices):
C_SAQ, C_SAK, C_SAV = 0, 32, 64        # self-attn  Wq | Wk | Wv
C_CAK, C_CAV = 96, 128                 # cross-attn Wk | Wv  (fused with block above)
C_CAQ, C_SAO, C_CAO = 160, 192, 224    # cross Wq, self Wo, cross Wo
C_FF1, C_FF2 = 256, 320                # ff_w1 (32x64), ff_w2 (64x32)
# Vector rows (lanes 0..319 of rows 32.. are free of weights):
R_BIAS = 32       # attn biases + ff_b1, lane-aligned with their weight columns
R_FFB2 = 33       # ff_b2 in lanes 0..31
R_LN = 34         # rows 34..39: ln1_g, ln1_b, ln2_g, ln2_b, ln3_g, ln3_b
P_ROWS, P_COLS = 64, 384


def _decoder_layer_kernel(act_ref, p_ref, out_ref):
    f32 = jnp.float32
    D = D_MODEL
    NT = B * T
    inv_sqrt_dk = 1.0 / math.sqrt(D_K)

    def layernorm(v, ln_idx):
        row = R_LN + 2 * ln_idx
        g = p_ref[row:row + 1, 0:D]
        beta = p_ref[row + 1:row + 2, 0:D]
        # single-pass stats: the two reductions are independent (can co-issue)
        s1 = jnp.sum(v, axis=-1, keepdims=True)
        s2 = jnp.sum(v * v, axis=-1, keepdims=True)
        mu = s1 * (1.0 / D)
        var = s2 * (1.0 / D) - mu * mu
        return (v - mu) * jax.lax.rsqrt(var + LN_EPS) * g + beta

    def to_heads(x2d, length):
        # (B*length, D) -> (H*B, length, d_k); leading-axis concat of lane slices
        x3 = x2d.reshape(B, length, D)
        return jnp.concatenate(
            [x3[:, :, h * D_K:(h + 1) * D_K] for h in range(NUM_HEADS)], axis=0)

    def attend(q2d, k2d, v2d, q_len, kv_len, wo_col):
        # q2d already carries the 1/sqrt(d_k) scale (folded once into Q)
        qh = to_heads(q2d, q_len)             # (H*B, q_len,  d_k)
        kh = to_heads(k2d, kv_len)            # (H*B, kv_len, d_k)
        vh = to_heads(v2d, kv_len)
        s = jnp.einsum("gqd,gkd->gqk", qh, kh, preferred_element_type=f32)
        s = s - jnp.max(s, axis=-1, keepdims=True)
        p = jnp.exp(s)
        p = p / jnp.sum(p, axis=-1, keepdims=True)      # exact division
        ctx = jnp.einsum("gqk,gkd->gqd", p, vh, preferred_element_type=f32)
        # reassemble heads -> (B*q_len, D), then ONE output projection with full Wo
        ctx2d = jnp.concatenate(
            [ctx[h * B:(h + 1) * B].reshape(B * q_len, D_K)
             for h in range(NUM_HEADS)], axis=-1)
        wo = p_ref[0:D, wo_col:wo_col + D]
        bo = p_ref[R_BIAS:R_BIAS + 1, wo_col:wo_col + D]
        return jnp.dot(ctx2d, wo, preferred_element_type=f32) + bo

    x_all = act_ref[...]                      # (B*(T+S), D) = [tgt rows ; mem rows]
    t = x_all[0:NT, :]                        # target activations (B*T, D)

    # Fused entry projection: [tgt; mem] @ [W_sa_q|W_sa_k|W_sa_v|W_ca_k|W_ca_v].
    # One (32,32)@(32,160) matmul yields self-attn QKV AND cross-attn K/V
    # (cross K/V hoisted off the LN1 -> cross-attn critical path). The mixed
    # tgt-x-cross / mem-x-self blocks are discarded (MXU utilization is tiny,
    # matmul COUNT is what costs here).
    w_fused = p_ref[0:D, C_SAQ:C_CAV + D]                 # (32, 160)
    b_fused = p_ref[R_BIAS:R_BIAS + 1, C_SAQ:C_CAV + D]   # (1, 160)
    fused = jnp.dot(x_all, w_fused, preferred_element_type=f32) + b_fused
    sa_qkv = fused[0:NT, 0:3 * D]             # tgt rows x self [Wq|Wk|Wv]
    ca_kv = fused[NT:, 3 * D:5 * D]           # mem rows x cross [Wk|Wv]

    # ---- self-attention + LN1 (dropout = identity in eval mode)
    sa_out = attend(sa_qkv[:, 0:D] * inv_sqrt_dk,
                    sa_qkv[:, D:2 * D], sa_qkv[:, 2 * D:3 * D], T, T, C_SAO)
    t = layernorm(t + sa_out, 0)

    # ---- cross-attention + LN2 (K/V already computed above)
    q_c = (jnp.dot(t, p_ref[0:D, C_CAQ:C_CAQ + D], preferred_element_type=f32)
           + p_ref[R_BIAS:R_BIAS + 1, C_CAQ:C_CAQ + D]) * inv_sqrt_dk
    ca_out = attend(q_c, ca_kv[:, 0:D], ca_kv[:, D:2 * D], T, S, C_CAO)
    t = layernorm(t + ca_out, 1)

    # ---- feed-forward + LN3
    h = jnp.maximum(
        jnp.dot(t, p_ref[0:D, C_FF1:C_FF1 + D_FF], preferred_element_type=f32)
        + p_ref[R_BIAS:R_BIAS + 1, C_FF1:C_FF1 + D_FF], 0.0)
    t2 = (jnp.dot(h, p_ref[0:D_FF, C_FF2:C_FF2 + D], preferred_element_type=f32)
          + p_ref[R_FFB2:R_FFB2 + 1, 0:D])
    t = layernorm(t + t2, 2)

    out_ref[...] = t.astype(out_ref.dtype)


def _pack_params(p):
    """Pack all 26 parameter arrays into one lane-dense (64, 384) f32 slab.

    Runs ONCE at init (make_decoder_layer), never on the per-call path.
    """
    slab = jnp.zeros((P_ROWS, P_COLS), jnp.float32)
    weights = [(C_SAQ, "sa_wq"), (C_SAK, "sa_wk"), (C_SAV, "sa_wv"),
               (C_CAK, "ca_wk"), (C_CAV, "ca_wv"), (C_CAQ, "ca_wq"),
               (C_SAO, "sa_wo"), (C_CAO, "ca_wo"),
               (C_FF1, "ff_w1"), (C_FF2, "ff_w2")]
    for col, name in weights:
        w = p[name]
        slab = slab.at[0:w.shape[0], col:col + w.shape[1]].set(w)
    biases = [(C_SAQ, "sa_bq"), (C_SAK, "sa_bk"), (C_SAV, "sa_bv"),
              (C_CAK, "ca_bk"), (C_CAV, "ca_bv"), (C_CAQ, "ca_bq"),
              (C_SAO, "sa_bo"), (C_CAO, "ca_bo"), (C_FF1, "ff_b1")]
    for col, name in biases:
        b = p[name]
        slab = slab.at[R_BIAS, col:col + b.shape[1]].set(b[0])
    slab = slab.at[R_FFB2, 0:D_MODEL].set(p["ff_b2"][0])
    for i, name in enumerate(["ln1_g", "ln1_b", "ln2_g", "ln2_b", "ln3_g", "ln3_b"]):
        slab = slab.at[R_LN + i, 0:D_MODEL].set(p[name][0])
    return slab


_VMEM_SPEC = pl.BlockSpec(memory_space=pltpu.MemorySpace.VMEM)

# NOTE(v7x): grid kept collapsed (single invocation); a 2-way "parallel" batch
# grid across the two TensorCores only pays off once B*T reaches hundreds of
# rows per core. VMEM working set here is well under the 32 MiB scoped default
# on every generation, so no vmem_limit_bytes override is needed.
_decoder_layer_call = pl.pallas_call(
    _decoder_layer_kernel,
    out_shape=jax.ShapeDtypeStruct((B * T, D_MODEL), jnp.float32),
    in_specs=[_VMEM_SPEC, _VMEM_SPEC],
    out_specs=_VMEM_SPEC,
)


@jax.jit
def _decoder_layer_fwd(tgt, memory, p_slab):
    # tgt: (B, T, D), memory: (B, S, D); activations stacked into one ref.
    act = jnp.concatenate(
        [tgt.reshape(B * T, D_MODEL), memory.reshape(B * S, D_MODEL)], axis=0)
    out2d = _decoder_layer_call(act, p_slab)
    return out2d.reshape(B, T, D_MODEL)


def make_decoder_layer(params):
    """Pack parameters once; return a jitted forward fn (tgt, memory) -> out."""
    p_slab = _pack_params(params)
    return lambda tgt, memory: _decoder_layer_fwd(tgt, memory, p_slab)


# ---------------- pure-JAX reference for verification ----------------
def _ref_mha(q_in, kv_in, wq, bq, wk, bk, wv, bv, wo, bo):
    Q = q_in @ wq + bq
    K = kv_in @ wk + bk
    V = kv_in @ wv + bv

    def split(x):
        b, l, _ = x.shape
        return x.reshape(b, l, NUM_HEADS, D_K).transpose(0, 2, 1, 3)

    Qh, Kh, Vh = split(Q) / math.sqrt(D_K), split(K), split(V)
    scores = jnp.einsum("bhqd,bhkd->bhqk", Qh, Kh)
    attn = jax.nn.softmax(scores, axis=-1)
    ctx = jnp.einsum("bhqk,bhkd->bhqd", attn, Vh)
    ctx = ctx.transpose(0, 2, 1, 3).reshape(q_in.shape[0], q_in.shape[1], D_MODEL)
    return ctx @ wo + bo


def _ref_ln(x, g, b):
    mu = jnp.mean(x, axis=-1, keepdims=True)
    var = jnp.mean((x - mu) ** 2, axis=-1, keepdims=True)
    return (x - mu) * jax.lax.rsqrt(var + LN_EPS) * g + b


def _ref_decoder(tgt, memory, p):
    t = tgt
    t2 = _ref_mha(t, t, p["sa_wq"], p["sa_bq"], p["sa_wk"], p["sa_bk"],
                  p["sa_wv"], p["sa_bv"], p["sa_wo"], p["sa_bo"])
    t = _ref_ln(t + t2, p["ln1_g"], p["ln1_b"])
    t2 = _ref_mha(t, memory, p["ca_wq"], p["ca_bq"], p["ca_wk"], p["ca_bk"],
                  p["ca_wv"], p["ca_bv"], p["ca_wo"], p["ca_bo"])
    t = _ref_ln(t + t2, p["ln2_g"], p["ln2_b"])
    h = jnp.maximum(t @ p["ff_w1"] + p["ff_b1"], 0.0)
    t2 = h @ p["ff_w2"] + p["ff_b2"]
    t = _ref_ln(t + t2, p["ln3_g"], p["ln3_b"])
    return t


def _init_params(key):
    params = {}
    shapes = {
        "sa_wq": (D_MODEL, D_MODEL), "sa_bq": (1, D_MODEL),
        "sa_wk": (D_MODEL, D_MODEL), "sa_bk": (1, D_MODEL),
        "sa_wv": (D_MODEL, D_MODEL), "sa_bv": (1, D_MODEL),
        "sa_wo": (D_MODEL, D_MODEL), "sa_bo": (1, D_MODEL),
        "ca_wq": (D_MODEL, D_MODEL), "ca_bq": (1, D_MODEL),
        "ca_wk": (D_MODEL, D_MODEL), "ca_bk": (1, D_MODEL),
        "ca_wv": (D_MODEL, D_MODEL), "ca_bv": (1, D_MODEL),
        "ca_wo": (D_MODEL, D_MODEL), "ca_bo": (1, D_MODEL),
        "ff_w1": (D_MODEL, D_FF), "ff_b1": (1, D_FF),
        "ff_w2": (D_FF, D_MODEL), "ff_b2": (1, D_MODEL),
    }
    keys = jax.random.split(key, len(shapes))
    for k, (name, shp) in zip(keys, shapes.items()):
        fan_in = shp[0] if name.endswith(("wq", "wk", "wv", "wo", "w1", "w2")) else shp[1]
        scale = 1.0 / math.sqrt(fan_in)
        params[name] = jax.random.uniform(k, shp, jnp.float32, -scale, scale)
    # LayerNorm affine params (torch default: gamma=1, beta=0)
    for i in (1, 2, 3):
        params[f"ln{i}_g"] = jnp.ones((1, D_MODEL), jnp.float32)
        params[f"ln{i}_b"] = jnp.zeros((1, D_MODEL), jnp.float32)
    return params


if __name__ == "__main__":
    key = jax.random.PRNGKey(0)
    k_tgt, k_mem, k_p = jax.random.split(key, 3)
    tgt = jax.random.normal(k_tgt, (B, T, D_MODEL), jnp.float32)
    memory = jax.random.normal(k_mem, (B, S, D_MODEL), jnp.float32)
    params = _init_params(k_p)

    decoder = make_decoder_layer(params)     # params packed ONCE here
    out = decoder(tgt, memory)
    out = jax.block_until_ready(out)

    ref = _ref_decoder(tgt, memory, params)
    assert out.shape == (B, T, D_MODEL)
    max_err = float(jnp.max(jnp.abs(out - ref)))
    # Approx softmax reciprocal removed; remaining deviation is only MXU
    # default-precision f32 matmul pass/accumulation-order differences and the
    # single-pass LN variance (both << 1e-3 at these magnitudes).
    assert jnp.allclose(out, ref, atol=1e-3, rtol=1e-3), f"mismatch vs reference: {max_err}"
    print("KERNEL_OK")
</pallas_src>

<mosaic_0001>
module attributes {stable_mosaic.version = 11 : i64} {
  func.func @_decoder_layer_kernel(%arg0: memref<32x32xf32, #tpu.memory_space<vmem>>, %arg1: memref<64x384xf32, #tpu.memory_space<vmem>>, %arg2: memref<16x32xf32, #tpu.memory_space<vmem>>) attributes {dimension_semantics = [], scalar_prefetch = 0 : i64, scratch_operands = 0 : i64, tpu.core_type = #tpu.core_type<tc>} {
    %c0 = arith.constant 0 : index
    %c0_0 = arith.constant 0 : index
    %0 = vector.load %arg0[%c0, %c0_0] : memref<32x32xf32, #tpu.memory_space<vmem>>, vector<32x32xf32>
    %1 = vector.extract_strided_slice %0 {offsets = [0, 0], sizes = [16, 32], strides = [1, 1]} : vector<32x32xf32> to vector<16x32xf32>
    %c0_1 = arith.constant 0 : index
    %c0_2 = arith.constant 0 : index
    %2 = vector.load %arg1[%c0_1, %c0_2] : memref<64x384xf32, #tpu.memory_space<vmem>>, vector<32x160xf32>
    %c32 = arith.constant 32 : index
    %c0_3 = arith.constant 0 : index
    %3 = vector.load %arg1[%c32, %c0_3] : memref<64x384xf32, #tpu.memory_space<vmem>>, vector<1x160xf32>
    %cst = arith.constant dense<0.000000e+00> : vector<32x160xf32>
    %4 = tpu.matmul %0, %2, %cst {dimension_numbers = #tpu.dot_dimension_numbers<[1], [0], [0], [1], [0, 0, 1, 1], [], []>} : vector<32x32xf32>, vector<32x160xf32>, vector<32x160xf32> -> vector<32x160xf32>
    %5 = vector.broadcast %3 : vector<1x160xf32> to vector<32x160xf32>
    %6 = arith.addf %4, %5 : vector<32x160xf32>
    %7 = vector.extract_strided_slice %6 {offsets = [0, 0], sizes = [16, 96], strides = [1, 1]} : vector<32x160xf32> to vector<16x96xf32>
    %8 = vector.extract_strided_slice %6 {offsets = [16, 96], sizes = [16, 64], strides = [1, 1]} : vector<32x160xf32> to vector<16x64xf32>
    %9 = vector.extract_strided_slice %7 {offsets = [0, 0], sizes = [16, 32], strides = [1, 1]} : vector<16x96xf32> to vector<16x32xf32>
    %cst_4 = arith.constant 0.353553385 : f32
    %10 = vector.broadcast %cst_4 : f32 to vector<16x32xf32>
    %11 = arith.mulf %9, %10 : vector<16x32xf32>
    %12 = vector.extract_strided_slice %7 {offsets = [0, 32], sizes = [16, 32], strides = [1, 1]} : vector<16x96xf32> to vector<16x32xf32>
    %13 = vector.extract_strided_slice %7 {offsets = [0, 64], sizes = [16, 32], strides = [1, 1]} : vector<16x96xf32> to vector<16x32xf32>
    %14 = vector.shape_cast %11 : vector<16x32xf32> to vector<2x8x32xf32>
    %15 = vector.extract_strided_slice %14 {offsets = [0, 0, 0], sizes = [2, 8, 8], strides = [1, 1, 1]} : vector<2x8x32xf32> to vector<2x8x8xf32>
    %16 = vector.extract_strided_slice %14 {offsets = [0, 0, 8], sizes = [2, 8, 8], strides = [1, 1, 1]} : vector<2x8x32xf32> to vector<2x8x8xf32>
    %17 = vector.extract_strided_slice %14 {offsets = [0, 0, 16], sizes = [2, 8, 8], strides = [1, 1, 1]} : vector<2x8x32xf32> to vector<2x8x8xf32>
    %18 = vector.extract_strided_slice %14 {offsets = [0, 0, 24], sizes = [2, 8, 8], strides = [1, 1, 1]} : vector<2x8x32xf32> to vector<2x8x8xf32>
    %19 = tpu.concatenate %15, %16, %17, %18 in 0 : vector<2x8x8xf32>, vector<2x8x8xf32>, vector<2x8x8xf32>, vector<2x8x8xf32> -> vector<8x8x8xf32>
    %20 = vector.shape_cast %12 : vector<16x32xf32> to vector<2x8x32xf32>
    %21 = vector.extract_strided_slice %20 {offsets = [0, 0, 0], sizes = [2, 8, 8], strides = [1, 1, 1]} : vector<2x8x32xf32> to vector<2x8x8xf32>
    %22 = vector.extract_strided_slice %20 {offsets = [0, 0, 8], sizes = [2, 8, 8], strides = [1, 1, 1]} : vector<2x8x32xf32> to vector<2x8x8xf32>
    %23 = vector.extract_strided_slice %20 {offsets = [0, 0, 16], sizes = [2, 8, 8], strides = [1, 1, 1]} : vector<2x8x32xf32> to vector<2x8x8xf32>
    %24 = vector.extract_strided_slice %20 {offsets = [0, 0, 24], sizes = [2, 8, 8], strides = [1, 1, 1]} : vector<2x8x32xf32> to vector<2x8x8xf32>
    %25 = tpu.concatenate %21, %22, %23, %24 in 0 : vector<2x8x8xf32>, vector<2x8x8xf32>, vector<2x8x8xf32>, vector<2x8x8xf32> -> vector<8x8x8xf32>
    %26 = vector.shape_cast %13 : vector<16x32xf32> to vector<2x8x32xf32>
    %27 = vector.extract_strided_slice %26 {offsets = [0, 0, 0], sizes = [2, 8, 8], strides = [1, 1, 1]} : vector<2x8x32xf32> to vector<2x8x8xf32>
    %28 = vector.extract_strided_slice %26 {offsets = [0, 0, 8], sizes = [2, 8, 8], strides = [1, 1, 1]} : vector<2x8x32xf32> to vector<2x8x8xf32>
    %29 = vector.extract_strided_slice %26 {offsets = [0, 0, 16], sizes = [2, 8, 8], strides = [1, 1, 1]} : vector<2x8x32xf32> to vector<2x8x8xf32>
    %30 = vector.extract_strided_slice %26 {offsets = [0, 0, 24], sizes = [2, 8, 8], strides = [1, 1, 1]} : vector<2x8x32xf32> to vector<2x8x8xf32>
    %31 = tpu.concatenate %27, %28, %29, %30 in 0 : vector<2x8x8xf32>, vector<2x8x8xf32>, vector<2x8x8xf32>, vector<2x8x8xf32> -> vector<8x8x8xf32>
    "tpu.trace_start"() <{level = 10 : i32, message = "gqd,gkd->gqk"}> : () -> ()
    %cst_5 = arith.constant dense<0.000000e+00> : vector<8x8x8xf32>
    %32 = tpu.matmul %19, %25, %cst_5 {dimension_numbers = #tpu.dot_dimension_numbers<[2], [2], [1], [1], [0, 0, 0, 1, 1, 1], [0], [0]>} : vector<8x8x8xf32>, vector<8x8x8xf32>, vector<8x8x8xf32> -> vector<8x8x8xf32>
    "tpu.trace_stop"() : () -> ()
    %cst_6 = arith.constant dense<0xFF800000> : vector<8x8xf32>
    %33 = vector.multi_reduction <maximumf>, %32, %cst_6 [2] : vector<8x8x8xf32> to vector<8x8xf32>
    %34 = vector.shape_cast %33 : vector<8x8xf32> to vector<8x8x1xf32>
    %35 = vector.broadcast %34 : vector<8x8x1xf32> to vector<8x8x8xf32>
    %36 = arith.subf %32, %35 : vector<8x8x8xf32>
    %37 = math.exp %36 : vector<8x8x8xf32>
    %cst_7 = arith.constant dense<0.000000e+00> : vector<8x8xf32>
    %38 = vector.multi_reduction <add>, %37, %cst_7 [2] : vector<8x8x8xf32> to vector<8x8xf32>
    %39 = vector.shape_cast %38 : vector<8x8xf32> to vector<8x8x1xf32>
    %40 = vector.broadcast %39 : vector<8x8x1xf32> to vector<8x8x8xf32>
    %41 = arith.divf %37, %40 : vector<8x8x8xf32>
    "tpu.trace_start"() <{level = 10 : i32, message = "gqk,gkd->gqd"}> : () -> ()
    %cst_8 = arith.constant dense<0.000000e+00> : vector<8x8x8xf32>
    %42 = tpu.matmul %41, %31, %cst_8 {dimension_numbers = #tpu.dot_dimension_numbers<[2], [1], [1], [2], [0, 0, 0, 1, 1, 2], [0], [0]>} : vector<8x8x8xf32>, vector<8x8x8xf32>, vector<8x8x8xf32> -> vector<8x8x8xf32>
    "tpu.trace_stop"() : () -> ()
    %43 = vector.extract_strided_slice %42 {offsets = [0, 0, 0], sizes = [2, 8, 8], strides = [1, 1, 1]} : vector<8x8x8xf32> to vector<2x8x8xf32>
    %44 = vector.shape_cast %43 : vector<2x8x8xf32> to vector<16x8xf32>
    %45 = vector.extract_strided_slice %42 {offsets = [2, 0, 0], sizes = [2, 8, 8], strides = [1, 1, 1]} : vector<8x8x8xf32> to vector<2x8x8xf32>
    %46 = vector.shape_cast %45 : vector<2x8x8xf32> to vector<16x8xf32>
    %47 = vector.extract_strided_slice %42 {offsets = [4, 0, 0], sizes = [2, 8, 8], strides = [1, 1, 1]} : vector<8x8x8xf32> to vector<2x8x8xf32>
    %48 = vector.shape_cast %47 : vector<2x8x8xf32> to vector<16x8xf32>
    %49 = vector.extract_strided_slice %42 {offsets = [6, 0, 0], sizes = [2, 8, 8], strides = [1, 1, 1]} : vector<8x8x8xf32> to vector<2x8x8xf32>
    %50 = vector.shape_cast %49 : vector<2x8x8xf32> to vector<16x8xf32>
    %51 = tpu.concatenate %44, %46, %48, %50 in 1 : vector<16x8xf32>, vector<16x8xf32>, vector<16x8xf32>, vector<16x8xf32> -> vector<16x32xf32>
    %c0_9 = arith.constant 0 : index
    %c192 = arith.constant 192 : index
    %52 = vector.load %arg1[%c0_9, %c192] : memref<64x384xf32, #tpu.memory_space<vmem>>, vector<32x32xf32>
    %c32_10 = arith.constant 32 : index
    %c192_11 = arith.constant 192 : index
    %53 = vector.load %arg1[%c32_10, %c192_11] : memref<64x384xf32, #tpu.memory_space<vmem>>, vector<1x32xf32>
    %cst_12 = arith.constant dense<0.000000e+00> : vector<16x32xf32>
    %54 = tpu.matmul %51, %52, %cst_12 {dimension_numbers = #tpu.dot_dimension_numbers<[1], [0], [0], [1], [0, 0, 1, 1], [], []>} : vector<16x32xf32>, vector<32x32xf32>, vector<16x32xf32> -> vector<16x32xf32>
    %55 = vector.broadcast %53 : vector<1x32xf32> to vector<16x32xf32>
    %56 = arith.addf %54, %55 : vector<16x32xf32>
    %57 = arith.addf %1, %56 : vector<16x32xf32>
    %c34 = arith.constant 34 : index
    %c0_13 = arith.constant 0 : index
    %58 = vector.load %arg1[%c34, %c0_13] : memref<64x384xf32, #tpu.memory_space<vmem>>, vector<1x32xf32>
    %c35 = arith.constant 35 : index
    %c0_14 = arith.constant 0 : index
    %59 = vector.load %arg1[%c35, %c0_14] : memref<64x384xf32, #tpu.memory_space<vmem>>, vector<1x32xf32>
    %cst_15 = arith.constant dense<0.000000e+00> : vector<16xf32>
    %60 = vector.multi_reduction <add>, %57, %cst_15 [1] : vector<16x32xf32> to vector<16xf32>
    %61 = vector.shape_cast %60 : vector<16xf32> to vector<16x1xf32>
    %62 = arith.mulf %57, %57 : vector<16x32xf32>
    %cst_16 = arith.constant dense<0.000000e+00> : vector<16xf32>
    %63 = vector.multi_reduction <add>, %62, %cst_16 [1] : vector<16x32xf32> to vector<16xf32>
    %64 = vector.shape_cast %63 : vector<16xf32> to vector<16x1xf32>
    %cst_17 = arith.constant 3.125000e-02 : f32
    %65 = vector.broadcast %cst_17 : f32 to vector<16x1xf32>
    %66 = arith.mulf %61, %65 : vector<16x1xf32>
    %cst_18 = arith.constant 3.125000e-02 : f32
    %67 = vector.broadcast %cst_18 : f32 to vector<16x1xf32>
    %68 = arith.mulf %64, %67 : vector<16x1xf32>
    %69 = arith.mulf %66, %66 : vector<16x1xf32>
    %70 = arith.subf %68, %69 : vector<16x1xf32>
    %71 = vector.broadcast %66 : vector<16x1xf32> to vector<16x32xf32>
    %72 = arith.subf %57, %71 : vector<16x32xf32>
    %cst_19 = arith.constant 9.99999974E-6 : f32
    %73 = vector.broadcast %cst_19 : f32 to vector<16x1xf32>
    %74 = arith.addf %70, %73 : vector<16x1xf32>
    %75 = math.rsqrt %74 : vector<16x1xf32>
    %76 = vector.broadcast %75 : vector<16x1xf32> to vector<16x32xf32>
    %77 = arith.mulf %72, %76 : vector<16x32xf32>
    %78 = vector.broadcast %58 : vector<1x32xf32> to vector<16x32xf32>
    %79 = arith.mulf %77, %78 : vector<16x32xf32>
    %80 = vector.broadcast %59 : vector<1x32xf32> to vector<16x32xf32>
    %81 = arith.addf %79, %80 : vector<16x32xf32>
    %c0_20 = arith.constant 0 : index
    %c160 = arith.constant 160 : index
    %82 = vector.load %arg1[%c0_20, %c160] : memref<64x384xf32, #tpu.memory_space<vmem>>, vector<32x32xf32>
    %cst_21 = arith.constant dense<0.000000e+00> : vector<16x32xf32>
    %83 = tpu.matmul %81, %82, %cst_21 {dimension_numbers = #tpu.dot_dimension_numbers<[1], [0], [0], [1], [0, 0, 1, 1], [], []>} : vector<16x32xf32>, vector<32x32xf32>, vector<16x32xf32> -> vector<16x32xf32>
    %c32_22 = arith.constant 32 : index
    %c160_23 = arith.constant 160 : index
    %84 = vector.load %arg1[%c32_22, %c160_23] : memref<64x384xf32, #tpu.memory_space<vmem>>, vector<1x32xf32>
    %85 = vector.broadcast %84 : vector<1x32xf32> to vector<16x32xf32>
    %86 = arith.addf %83, %85 : vector<16x32xf32>
    %cst_24 = arith.constant 0.353553385 : f32
    %87 = vector.broadcast %cst_24 : f32 to vector<16x32xf32>
    %88 = arith.mulf %86, %87 : vector<16x32xf32>
    %89 = vector.extract_strided_slice %8 {offsets = [0, 0], sizes = [16, 32], strides = [1, 1]} : vector<16x64xf32> to vector<16x32xf32>
    %90 = vector.extract_strided_slice %8 {offsets = [0, 32], sizes = [16, 32], strides = [1, 1]} : vector<16x64xf32> to vector<16x32xf32>
    %91 = vector.shape_cast %88 : vector<16x32xf32> to vector<2x8x32xf32>
    %92 = vector.extract_strided_slice %91 {offsets = [0, 0, 0], sizes = [2, 8, 8], strides = [1, 1, 1]} : vector<2x8x32xf32> to vector<2x8x8xf32>
    %93 = vector.extract_strided_slice %91 {offsets = [0, 0, 8], sizes = [2, 8, 8], strides = [1, 1, 1]} : vector<2x8x32xf32> to vector<2x8x8xf32>
    %94 = vector.extract_strided_slice %91 {offsets = [0, 0, 16], sizes = [2, 8, 8], strides = [1, 1, 1]} : vector<2x8x32xf32> to vector<2x8x8xf32>
    %95 = vector.extract_strided_slice %91 {offsets = [0, 0, 24], sizes = [2, 8, 8], strides = [1, 1, 1]} : vector<2x8x32xf32> to vector<2x8x8xf32>
    %96 = tpu.concatenate %92, %93, %94, %95 in 0 : vector<2x8x8xf32>, vector<2x8x8xf32>, vector<2x8x8xf32>, vector<2x8x8xf32> -> vector<8x8x8xf32>
    %97 = vector.shape_cast %89 : vector<16x32xf32> to vector<2x8x32xf32>
    %98 = vector.extract_strided_slice %97 {offsets = [0, 0, 0], sizes = [2, 8, 8], strides = [1, 1, 1]} : vector<2x8x32xf32> to vector<2x8x8xf32>
    %99 = vector.extract_strided_slice %97 {offsets = [0, 0, 8], sizes = [2, 8, 8], strides = [1, 1, 1]} : vector<2x8x32xf32> to vector<2x8x8xf32>
    %100 = vector.extract_strided_slice %97 {offsets = [0, 0, 16], sizes = [2, 8, 8], strides = [1, 1, 1]} : vector<2x8x32xf32> to vector<2x8x8xf32>
    %101 = vector.extract_strided_slice %97 {offsets = [0, 0, 24], sizes = [2, 8, 8], strides = [1, 1, 1]} : vector<2x8x32xf32> to vector<2x8x8xf32>
    %102 = tpu.concatenate %98, %99, %100, %101 in 0 : vector<2x8x8xf32>, vector<2x8x8xf32>, vector<2x8x8xf32>, vector<2x8x8xf32> -> vector<8x8x8xf32>
    %103 = vector.shape_cast %90 : vector<16x32xf32> to vector<2x8x32xf32>
    %104 = vector.extract_strided_slice %103 {offsets = [0, 0, 0], sizes = [2, 8, 8], strides = [1, 1, 1]} : vector<2x8x32xf32> to vector<2x8x8xf32>
    %105 = vector.extract_strided_slice %103 {offsets = [0, 0, 8], sizes = [2, 8, 8], strides = [1, 1, 1]} : vector<2x8x32xf32> to vector<2x8x8xf32>
    %106 = vector.extract_strided_slice %103 {offsets = [0, 0, 16], sizes = [2, 8, 8], strides = [1, 1, 1]} : vector<2x8x32xf32> to vector<2x8x8xf32>
    %107 = vector.extract_strided_slice %103 {offsets = [0, 0, 24], sizes = [2, 8, 8], strides = [1, 1, 1]} : vector<2x8x32xf32> to vector<2x8x8xf32>
    %108 = tpu.concatenate %104, %105, %106, %107 in 0 : vector<2x8x8xf32>, vector<2x8x8xf32>, vector<2x8x8xf32>, vector<2x8x8xf32> -> vector<8x8x8xf32>
    "tpu.trace_start"() <{level = 10 : i32, message = "gqd,gkd->gqk"}> : () -> ()
    %cst_25 = arith.constant dense<0.000000e+00> : vector<8x8x8xf32>
    %109 = tpu.matmul %96, %102, %cst_25 {dimension_numbers = #tpu.dot_dimension_numbers<[2], [2], [1], [1], [0, 0, 0, 1, 1, 1], [0], [0]>} : vector<8x8x8xf32>, vector<8x8x8xf32>, vector<8x8x8xf32> -> vector<8x8x8xf32>
    "tpu.trace_stop"() : () -> ()
    %cst_26 = arith.constant dense<0xFF800000> : vector<8x8xf32>
    %110 = vector.multi_reduction <maximumf>, %109, %cst_26 [2] : vector<8x8x8xf32> to vector<8x8xf32>
    %111 = vector.shape_cast %110 : vector<8x8xf32> to vector<8x8x1xf32>
    %112 = vector.broadcast %111 : vector<8x8x1xf32> to vector<8x8x8xf32>
    %113 = arith.subf %109, %112 : vector<8x8x8xf32>
    %114 = math.exp %113 : vector<8x8x8xf32>
    %cst_27 = arith.constant dense<0.000000e+00> : vector<8x8xf32>
    %115 = vector.multi_reduction <add>, %114, %cst_27 [2] : vector<8x8x8xf32> to vector<8x8xf32>
    %116 = vector.shape_cast %115 : vector<8x8xf32> to vector<8x8x1xf32>
    %117 = vector.broadcast %116 : vector<8x8x1xf32> to vector<8x8x8xf32>
    %118 = arith.divf %114, %117 : vector<8x8x8xf32>
    "tpu.trace_start"() <{level = 10 : i32, message = "gqk,gkd->gqd"}> : () -> ()
    %cst_28 = arith.constant dense<0.000000e+00> : vector<8x8x8xf32>
    %119 = tpu.matmul %118, %108, %cst_28 {dimension_numbers = #tpu.dot_dimension_numbers<[2], [1], [1], [2], [0, 0, 0, 1, 1, 2], [0], [0]>} : vector<8x8x8xf32>, vector<8x8x8xf32>, vector<8x8x8xf32> -> vector<8x8x8xf32>
    "tpu.trace_stop"() : () -> ()
    %120 = vector.extract_strided_slice %119 {offsets = [0, 0, 0], sizes = [2, 8, 8], strides = [1, 1, 1]} : vector<8x8x8xf32> to vector<2x8x8xf32>
    %121 = vector.shape_cast %120 : vector<2x8x8xf32> to vector<16x8xf32>
    %122 = vector.extract_strided_slice %119 {offsets = [2, 0, 0], sizes = [2, 8, 8], strides = [1, 1, 1]} : vector<8x8x8xf32> to vector<2x8x8xf32>
    %123 = vector.shape_cast %122 : vector<2x8x8xf32> to vector<16x8xf32>
    %124 = vector.extract_strided_slice %119 {offsets = [4, 0, 0], sizes = [2, 8, 8], strides = [1, 1, 1]} : vector<8x8x8xf32> to vector<2x8x8xf32>
    %125 = vector.shape_cast %124 : vector<2x8x8xf32> to vector<16x8xf32>
    %126 = vector.extract_strided_slice %119 {offsets = [6, 0, 0], sizes = [2, 8, 8], strides = [1, 1, 1]} : vector<8x8x8xf32> to vector<2x8x8xf32>
    %127 = vector.shape_cast %126 : vector<2x8x8xf32> to vector<16x8xf32>
    %128 = tpu.concatenate %121, %123, %125, %127 in 1 : vector<16x8xf32>, vector<16x8xf32>, vector<16x8xf32>, vector<16x8xf32> -> vector<16x32xf32>
    %c0_29 = arith.constant 0 : index
    %c224 = arith.constant 224 : index
    %129 = vector.load %arg1[%c0_29, %c224] : memref<64x384xf32, #tpu.memory_space<vmem>>, vector<32x32xf32>
    %c32_30 = arith.constant 32 : index
    %c224_31 = arith.constant 224 : index
    %130 = vector.load %arg1[%c32_30, %c224_31] : memref<64x384xf32, #tpu.memory_space<vmem>>, vector<1x32xf32>
    %cst_32 = arith.constant dense<0.000000e+00> : vector<16x32xf32>
    %131 = tpu.matmul %128, %129, %cst_32 {dimension_numbers = #tpu.dot_dimension_numbers<[1], [0], [0], [1], [0, 0, 1, 1], [], []>} : vector<16x32xf32>, vector<32x32xf32>, vector<16x32xf32> -> vector<16x32xf32>
    %132 = vector.broadcast %130 : vector<1x32xf32> to vector<16x32xf32>
    %133 = arith.addf %131, %132 : vector<16x32xf32>
    %134 = arith.addf %81, %133 : vector<16x32xf32>
    %c36 = arith.constant 36 : index
    %c0_33 = arith.constant 0 : index
    %135 = vector.load %arg1[%c36, %c0_33] : memref<64x384xf32, #tpu.memory_space<vmem>>, vector<1x32xf32>
    %c37 = arith.constant 37 : index
    %c0_34 = arith.constant 0 : index
    %136 = vector.load %arg1[%c37, %c0_34] : memref<64x384xf32, #tpu.memory_space<vmem>>, vector<1x32xf32>
    %cst_35 = arith.constant dense<0.000000e+00> : vector<16xf32>
    %137 = vector.multi_reduction <add>, %134, %cst_35 [1] : vector<16x32xf32> to vector<16xf32>
    %138 = vector.shape_cast %137 : vector<16xf32> to vector<16x1xf32>
    %139 = arith.mulf %134, %134 : vector<16x32xf32>
    %cst_36 = arith.constant dense<0.000000e+00> : vector<16xf32>
    %140 = vector.multi_reduction <add>, %139, %cst_36 [1] : vector<16x32xf32> to vector<16xf32>
    %141 = vector.shape_cast %140 : vector<16xf32> to vector<16x1xf32>
    %cst_37 = arith.constant 3.125000e-02 : f32
    %142 = vector.broadcast %cst_37 : f32 to vector<16x1xf32>
    %143 = arith.mulf %138, %142 : vector<16x1xf32>
    %cst_38 = arith.constant 3.125000e-02 : f32
    %144 = vector.broadcast %cst_38 : f32 to vector<16x1xf32>
    %145 = arith.mulf %141, %144 : vector<16x1xf32>
    %146 = arith.mulf %143, %143 : vector<16x1xf32>
    %147 = arith.subf %145, %146 : vector<16x1xf32>
    %148 = vector.broadcast %143 : vector<16x1xf32> to vector<16x32xf32>
    %149 = arith.subf %134, %148 : vector<16x32xf32>
    %cst_39 = arith.constant 9.99999974E-6 : f32
    %150 = vector.broadcast %cst_39 : f32 to vector<16x1xf32>
    %151 = arith.addf %147, %150 : vector<16x1xf32>
    %152 = math.rsqrt %151 : vector<16x1xf32>
    %153 = vector.broadcast %152 : vector<16x1xf32> to vector<16x32xf32>
    %154 = arith.mulf %149, %153 : vector<16x32xf32>
    %155 = vector.broadcast %135 : vector<1x32xf32> to vector<16x32xf32>
    %156 = arith.mulf %154, %155 : vector<16x32xf32>
    %157 = vector.broadcast %136 : vector<1x32xf32> to vector<16x32xf32>
    %158 = arith.addf %156, %157 : vector<16x32xf32>
    %c0_40 = arith.constant 0 : index
    %c256 = arith.constant 256 : index
    %159 = vector.load %arg1[%c0_40, %c256] : memref<64x384xf32, #tpu.memory_space<vmem>>, vector<32x64xf32>
    %cst_41 = arith.constant dense<0.000000e+00> : vector<16x64xf32>
    %160 = tpu.matmul %158, %159, %cst_41 {dimension_numbers = #tpu.dot_dimension_numbers<[1], [0], [0], [1], [0, 0, 1, 1], [], []>} : vector<16x32xf32>, vector<32x64xf32>, vector<16x64xf32> -> vector<16x64xf32>
    %c32_42 = arith.constant 32 : index
    %c256_43 = arith.constant 256 : index
    %161 = vector.load %arg1[%c32_42, %c256_43] : memref<64x384xf32, #tpu.memory_space<vmem>>, vector<1x64xf32>
    %162 = vector.broadcast %161 : vector<1x64xf32> to vector<16x64xf32>
    %163 = arith.addf %160, %162 : vector<16x64xf32>
    %cst_44 = arith.constant 0.000000e+00 : f32
    %164 = vector.broadcast %cst_44 : f32 to vector<16x64xf32>
    %165 = arith.maximumf %163, %164 : vector<16x64xf32>
    %c0_45 = arith.constant 0 : index
    %c320 = arith.constant 320 : index
    %166 = vector.load %arg1[%c0_45, %c320] : memref<64x384xf32, #tpu.memory_space<vmem>>, vector<64x32xf32>
    %cst_46 = arith.constant dense<0.000000e+00> : vector<16x32xf32>
    %167 = tpu.matmul %165, %166, %cst_46 {dimension_numbers = #tpu.dot_dimension_numbers<[1], [0], [0], [1], [0, 0, 1, 1], [], []>} : vector<16x64xf32>, vector<64x32xf32>, vector<16x32xf32> -> vector<16x32xf32>
    %c33 = arith.constant 33 : index
    %c0_47 = arith.constant 0 : index
    %168 = vector.load %arg1[%c33, %c0_47] : memref<64x384xf32, #tpu.memory_space<vmem>>, vector<1x32xf32>
    %169 = vector.broadcast %168 : vector<1x32xf32> to vector<16x32xf32>
    %170 = arith.addf %167, %169 : vector<16x32xf32>
    %171 = arith.addf %158, %170 : vector<16x32xf32>
    %c38 = arith.constant 38 : index
    %c0_48 = arith.constant 0 : index
    %172 = vector.load %arg1[%c38, %c0_48] : memref<64x384xf32, #tpu.memory_space<vmem>>, vector<1x32xf32>
    %c39 = arith.constant 39 : index
    %c0_49 = arith.constant 0 : index
    %173 = vector.load %arg1[%c39, %c0_49] : memref<64x384xf32, #tpu.memory_space<vmem>>, vector<1x32xf32>
    %cst_50 = arith.constant dense<0.000000e+00> : vector<16xf32>
    %174 = vector.multi_reduction <add>, %171, %cst_50 [1] : vector<16x32xf32> to vector<16xf32>
    %175 = vector.shape_cast %174 : vector<16xf32> to vector<16x1xf32>
    %176 = arith.mulf %171, %171 : vector<16x32xf32>
    %cst_51 = arith.constant dense<0.000000e+00> : vector<16xf32>
    %177 = vector.multi_reduction <add>, %176, %cst_51 [1] : vector<16x32xf32> to vector<16xf32>
    %178 = vector.shape_cast %177 : vector<16xf32> to vector<16x1xf32>
    %cst_52 = arith.constant 3.125000e-02 : f32
    %179 = vector.broadcast %cst_52 : f32 to vector<16x1xf32>
    %180 = arith.mulf %175, %179 : vector<16x1xf32>
    %cst_53 = arith.constant 3.125000e-02 : f32
    %181 = vector.broadcast %cst_53 : f32 to vector<16x1xf32>
    %182 = arith.mulf %178, %181 : vector<16x1xf32>
    %183 = arith.mulf %180, %180 : vector<16x1xf32>
    %184 = arith.subf %182, %183 : vector<16x1xf32>
    %185 = vector.broadcast %180 : vector<16x1xf32> to vector<16x32xf32>
    %186 = arith.subf %171, %185 : vector<16x32xf32>
    %cst_54 = arith.constant 9.99999974E-6 : f32
    %187 = vector.broadcast %cst_54 : f32 to vector<16x1xf32>
    %188 = arith.addf %184, %187 : vector<16x1xf32>
    %189 = math.rsqrt %188 : vector<16x1xf32>
    %190 = vector.broadcast %189 : vector<16x1xf32> to vector<16x32xf32>
    %191 = arith.mulf %186, %190 : vector<16x32xf32>
    %192 = vector.broadcast %172 : vector<1x32xf32> to vector<16x32xf32>
    %193 = arith.mulf %191, %192 : vector<16x32xf32>
    %194 = vector.broadcast %173 : vector<1x32xf32> to vector<16x32xf32>
    %195 = arith.addf %193, %194 : vector<16x32xf32>
    %c0_55 = arith.constant 0 : index
    %c0_56 = arith.constant 0 : index
    %196 = vector.load %arg2[%c0_55, %c0_56] : memref<16x32xf32, #tpu.memory_space<vmem>>, vector<16x32xf32>
    tpu.vector_store %arg2[%c0_55, %c0_56], %195 {strides = array<i32>} : memref<16x32xf32, #tpu.memory_space<vmem>>, vector<16x32xf32>,
    return
  }
}

</mosaic_0001>

<bundles_post_ra>
// kernel: _decoder_layer_fwd.1
= control target key start
LH: loop header
LB: loop body
LE: loop exit
PB: predicated region body
PF: predicated region fallthrough
CT: control target
= control target key end

     0   :  { %7 = vsyncpa [#allocation3], 0  ;;  %s4588_s0 = inlined_call_operand.vmem [shape: f32[32,32], index: 0, kind: input, shape index: {}]   ;;  %s4589_s1 = inlined_call_operand.hbm [shape: f32[64,384], index: 1, kind: input, shape index: {}]   ;;  %s4590_s2 = inlined_call_operand.hbm [shape: f32[16,32], index: 2, kind: output, shape index: {}]  }
   0x1   :  { %8 = vsyncpa [#allocation4], 0  ;;  %s4048_s9 = smov [#allocation2]  }
   0x2   :  { %s16_s10 = sshll.u32 %s4048_s9, 4  ;;  %s17_s10 = int_to_ptr.vmem [resolvable:$true] %s16_s10 }
   0x3   :  { %s4012_s11 = scalar_lea.vmem %s17_s10, 3072  ;;  %p4017_p1 = scmp.lt.s32.totalorder %s17_s10, %s17_s10 }
   0x4   :  { %p4013_p0 = scmp.ne.s32.totalorder %s17_s10, %s4012_s11  ;;  %p4018_p2 = scmp.lt.s32.totalorder %s4012_s11, %s4012_s11 }
   0x6   :  { %p4019_p3 = por %p4018_p2, %p4017_p1 }
   0x8   :  { %p4020_p4 = pnand %p4019_p3, %p4013_p0 }
   0xa   :  { %4023 = shalt.err (!%p4020_p4)
}
   0xb   :  { %s4049_s12 = smov 384   ;;  %s4050_s13 = smov 24  }
   0xc   :  { %22 = dma.hbm_to_vmem [thread:$0]  %s4589_s1, 3072, %s17_s10, [#allocation3], %s4049_s12, %s4049_s12, %s4050_s13  }
   0xd   :  { %4044 = dma.done.wait [#allocation3], 3072  }
   0xe   :  { %4045 = vsyncadd [#allocation3], 4294964224  ;;  %v4051_v0 = vmov 0.0   ;;  %v4084_v1 = vld [vmem:[#allocation2 + $0x50] sm:$0xff]  ;;  %v36_v2 = vld [vmem:[#allocation2 + $0x48] sm:$0xff]  ;;  %vm51_vm0 = vcmask 261120   ;;  %v41_v11 = vlaneseq }
   0xf   :  { %128 = vmatprep.mubr.f32.mxu0 %v4051_v0  ;;  %3695 = vmatprep.subr.mxu1 %v4051_v0  ;;  %v4086_v3 = vld [vmem:[#allocation2 + $0x38] sm:$0xff]  ;;  %v34_v4 = vld [vmem:[#allocation2 + $0x30] sm:$0xff]  ;;  %v4089_v5 = vld [vmem:[#allocation2 + $0x20] sm:$0xff]  ;;  %s4052_s23 = smov 112   ;;  %s4053_s24 = smov 120   ;;  %vm4054_vm1 = vmmov 0  }
  0x10   :  { %88 = vmatprep.subr.mxu0 %v4084_v1  ;;  %v32_v6 = vld [vmem:[#allocation2 + $0x18] sm:$0xff]  ;;  %v4092_v7 = vld [vmem:[#allocation2 + $0x8] sm:$0xff]  ;;  %v30_v8 = vld [vmem:[#allocation2] sm:$0xff]  ;;  %v4113_v12 = vshrl.u32 %v41_v11, 7  ;;  %3697 = vmatprep.mubr.msk.f32.mxu1 %vm4054_vm1, %v4051_v0  ;;  %s4056_s25 = smov 96   ;;  %vm183_vm2 = vcmask 64512  }
  0x11   :  { %89 = vmatpush1.msra.mxu0 %v36_v2  ;;  %v4098_v9 = vld [vmem:[%s4588_s0] sm:$0xff]  ;;  %v4108_v10 = vld [vmem:[%s4588_s0 + $0x8] sm:$0xff]  ;;  %v28_v15 = vld [vmem:[%s4588_s0 + $0x10] sm:$0xff]  ;;  %s4057_s26 = smov 64   ;;  %s4058_s27 = smov 8   ;;  %vm1512_vm3 = vcmask 130048  }
  0x12   :  { %90 = vmatprep.subr.mxu0 %v4086_v3  ;;  %v43_v13 = vsub.s32 0, %v4113_v12  ;;  %v4116_v14 = vld [vmem:[#allocation2 + $0x60] ss:$8 sm:$0x3]  ;;  %v29_v17 = vld [vmem:[%s4588_s0 + $0x18] sm:$0xff]  ;;  %s4055_s0 = smov 104  }
  0x13   :  { %91 = vmatpush1.msra.mxu0 %v34_v4  ;;  %s4059_s28 = smov 16   ;;  %vm1515_vm4 = vcmask 195584   ;;  %s4060_s29 = smov 32   ;;  %vm3391_vm5 = vcmask 523264  }
  0x14   :  { %92 = vmatprep.subr.mxu0 %v4089_v5  ;;  %v4124_v16 = vrot.slane %v4116_v14, %v43_v13  ;;  %s4061_s30 = smov [#allocation5]  }
  0x15   :  { %93 = vmatpush1.msra.mxu0 %v32_v6  ;;  %s3518_s3 = sshll.u32 %s4061_s30, 4  ;;  %s3519_s3 = int_to_ptr.vmem [resolvable:$true] %s3518_s3 }
  0x16   :  { %94 = vmatprep.subr.mxu0 %v4092_v7  ;;  %s4024_s4 = scalar_lea.vmem %s3519_s3, 256  ;;  %p4029_p6 = scmp.lt.s32.totalorder %s3519_s3, %s3519_s3 }
  0x17   :  { %95 = vmatpush1.msra.mxu0 %v30_v8  ;;  %p4025_p5 = scmp.ne.s32.totalorder %s3519_s3, %s4024_s4  ;;  %p4030_p7 = scmp.lt.s32.totalorder %s4024_s4, %s4024_s4 }
  0x18   :  { %3530 = vmatmul.mubr.msk.f32.vlgmr.msra.gmra.mxu0 %vm51_vm0, %v4098_v9  ;;  %3690 = vmatprep.subr.mxu0 %v4051_v0 }
  0x19   :  { %133 = vmatprep.mubr.f32.mxu0 %v4051_v0  ;;  %p4031_p8 = por %p4030_p7, %p4029_p6 }
  0x1b   :  { %p4032_p9 = pnand %p4031_p8, %p4025_p5 }
  0x1c   :  { %3531 = vmatmul.mubr.msk.f32.gmra.mxu0 %vm51_vm0, %v4108_v10 }
  0x1d   :  { %138 = vmatprep.mubr.f32.mxu0 %v4051_v0 }
  0x20   :  { %3532 = vmatmul.mubr.msk.f32.gmra.mxu0 %vm51_vm0, %v28_v15 }
  0x21   :  { %144 = vmatprep.mubr.f32.mxu0 %v4051_v0 }
  0x24   :  { %3533 = vmatmul.mubr.msk.f32.gmra.mxu0 %vm51_vm0, %v29_v17 }
  0x25   :  { %3692 = vmatprep.mubr.msk.f32.mxu0 %vm4054_vm1, %v4051_v0 }
  0xd8   :  { %v130_v18 = vpop.f32.mrf.mxu0 }
  0xd9   :  { %v4131_v19 = vadd.f32 %v130_v18, %v4124_v16 }
  0xda   :  { %v132_v20 = vpop.f32.mrf.mxu0 }
  0xdb   :  { %173 = vrot.lane.b32.xlu1 %v4131_v19, %s4052_s23  ;;  %169 = vrot.lane.b32.xlu0 %v4131_v19, %s4053_s24  ;;  %v151_v24 = vmul.f32 0.35355338, %v4131_v19 }
  0xdc   :  { %v135_v21 = vpop.f32.mrf.mxu0 }
  0xdd   :  { %v4142_v22 = vadd.f32 %v135_v21, %v4124_v16 }
  0xde   :  { %v137_v23 = vpop.f32.mrf.mxu0 }
  0xdf   :  { %175 = vrot.lane.b32.xlu1 %v4142_v22, %s4052_s23  ;;  %171 = vrot.lane.b32.xlu0 %v4142_v22, %s4053_s24  ;;  %v152_v25 = vmul.f32 0.35355338, %v4142_v22 }
  0xe0   :  { %v4228_v46 = vpop.f32.mrf.mxu0 }
  0xe2   :  { %v4230_v47 = vpop.f32.mrf.mxu0 }
  0xe3   :  { %179 = vrot.lane.b32.xlu1 %v4142_v22, %s4055_s0  ;;  %177 = vrot.lane.b32.xlu0 %v4131_v19, %s4055_s0 }
  0xe4   :  { %v4232_v48 = vpop.f32.mrf.mxu0 }
  0xe6   :  { %v4234_v49 = vpop.f32.mrf.mxu0 }
  0xe7   :  { %181 = vrot.lane.b32.xlu1 %v4131_v19, %s4056_s25  ;;  %258 = vrot.lane.b32.xlu0 %v4142_v22, %s4056_s25 }
  0xeb   :  { %155 = vrot.lane.b32.xlu1 %v151_v24, %s4053_s24 }
  0xef   :  { %157 = vrot.lane.b32.xlu1 %v152_v25, %s4053_s24 }
  0xf3   :  { %161 = vrot.lane.b32.xlu1 %v152_v25, %s4052_s23 }
 0x14d   :  { %v4161_v26 = vpop.permute.xlu1 %173  ;;  %v4163_v27 = vpop.permute.xlu0 %169 }
 0x14e   :  { %334 = vrot.lane.b32.xlu0 %v4163_v27, %s4056_s25 }
 0x151   :  { %v4167_v28 = vpop.permute.xlu1 %175  ;;  %v4169_v29 = vpop.permute.xlu0 %171 }
 0x152   :  { %486 = vrot.lane.b32.xlu0 %v4161_v26, %s4056_s25  ;;  %562 = vrot.lane.b32.xlu1 %v4167_v28, %s4056_s25 }
 0x155   :  { %v4175_v30 = vpop.permute.xlu1 %179  ;;  %v4177_v31 = vpop.permute.xlu0 %177 }
 0x156   :  { %410 = vrot.lane.b32.xlu0 %v4169_v29, %s4056_s25  ;;  %714 = vrot.lane.b32.xlu1 %v4175_v30, %s4056_s25 }
 0x159   :  { %v182_v32 = vpop.permute.xlu1 %181  ;;  %v259_v33 = vpop.permute.xlu0 %258 }
 0x15a   :  { %3691 = vmatpush3.xpose.msk.msra.mxu0 %vm183_vm2, %v182_v32  ;;  %3696 = vmatpush3.xpose.msk.msra.mxu1 %vm183_vm2, %v259_v33 }
 0x15b   :  { %159 = vrot.lane.b32.xlu0 %v151_v24, %s4052_s23  ;;  %165 = vrot.lane.b32.xlu1 %v152_v25, %s4055_s0 }
 0x15c   :  { %3700 = vmatprep.subr.mxu1 %v4051_v0  ;;  %3715 = vmatprep.subr.mxu0 %v4051_v0 }
 0x15d   :  { %3698 = vmatmul.mubr.msk.f32.vlgmr.msra.gmra.mxu1 %vm183_vm2, %v152_v25  ;;  %3693 = vmatmul.mubr.msk.f32.vlgmr.msra.gmra.mxu0 %vm183_vm2, %v151_v24  ;;  %v156_v34 = vpop.permute.xlu1 %155 }
 0x15e   :  { %3702 = vmatprep.mubr.msk.f32.mxu1 %vm4054_vm1, %v4051_v0  ;;  %3717 = vmatprep.mubr.msk.f32.mxu0 %vm4054_vm1, %v4051_v0 }
 0x15f   :  { %638 = vrot.lane.b32.xlu0 %v4177_v31, %s4056_s25 }
 0x161   :  { %v158_v35 = vpop.permute.xlu1 %157 }
 0x163   :  { %163 = vrot.lane.b32.xlu0 %v151_v24, %s4055_s0 }
 0x165   :  { %v162_v36 = vpop.permute.xlu1 %161 }
 0x1c0   :  { %v335_v37 = vpop.permute.xlu0 %334 }
 0x1c1   :  { %3701 = vmatpush3.xpose.msk.msra.mxu1 %vm183_vm2, %v335_v37 }
 0x1c2   :  { %3705 = vmatprep.subr.mxu1 %v4051_v0 }
 0x1c4   :  { %v487_v38 = vpop.permute.xlu0 %486  ;;  %3703 = vmatmul.mubr.msk.f32.vlgmr.msra.gmra.mxu1 %vm183_vm2, %v156_v34  ;;  %v563_v39 = vpop.permute.xlu1 %562 }
 0x1c5   :  { %3716 = vmatpush3.xpose.msk.msra.mxu0 %vm183_vm2, %v563_v39  ;;  %3707 = vmatprep.mubr.msk.f32.mxu1 %vm4054_vm1, %v4051_v0 }
 0x1c6   :  { %3725 = vmatprep.subr.mxu0 %v4051_v0 }
 0x1c8   :  { %v411_v40 = vpop.permute.xlu0 %410  ;;  %v715_v41 = vpop.permute.xlu1 %714  ;;  %3718 = vmatmul.mubr.msk.f32.vlgmr.msra.gmra.mxu0 %vm183_vm2, %v162_v36 }
 0x1c9   :  { %3706 = vmatpush3.xpose.msk.msra.mxu1 %vm183_vm2, %v411_v40  ;;  %3726 = vmatpush3.xpose.msk.msra.mxu0 %vm183_vm2, %v715_v41 }
 0x1ca   :  { %3710 = vmatprep.subr.mxu1 %v4051_v0  ;;  %3727 = vmatprep.mubr.msk.f32.mxu0 %vm4054_vm1, %v4051_v0 }
 0x1cb   :  { %3735 = vmatprep.subr.mxu0 %v4051_v0 }
 0x1cc   :  { %3708 = vmatmul.mubr.msk.f32.vlgmr.msra.gmra.mxu1 %vm183_vm2, %v158_v35 }
 0x1cd   :  { %v160_v42 = vpop.permute.xlu0 %159  ;;  %v166_v43 = vpop.permute.xlu1 %165  ;;  %3711 = vmatpush3.xpose.msk.msra.mxu1 %vm183_vm2, %v487_v38  ;;  %3712 = vmatprep.mubr.msk.f32.mxu1 %vm4054_vm1, %v4051_v0 }
 0x1ce   :  { %3728 = vmatmul.mubr.msk.f32.vlgmr.msra.gmra.mxu0 %vm183_vm2, %v166_v43  ;;  %3720 = vmatprep.subr.mxu1 %v4051_v0 }
 0x1cf   :  { %3737 = vmatprep.mubr.msk.f32.mxu0 %vm4054_vm1, %v4051_v0 }
 0x1d0   :  { %3713 = vmatmul.mubr.msk.f32.vlgmr.msra.gmra.mxu1 %vm183_vm2, %v160_v42 }
 0x1d1   :  { %v639_v44 = vpop.permute.xlu0 %638  ;;  %3722 = vmatprep.mubr.msk.f32.mxu1 %vm4054_vm1, %v4051_v0 }
 0x1d2   :  { %3721 = vmatpush3.xpose.msk.msra.mxu1 %vm183_vm2, %v639_v44 }
 0x1d3   :  { %3730 = vmatprep.subr.mxu1 %v4051_v0 }
 0x1d5   :  { %v164_v45 = vpop.permute.xlu0 %163 }
 0x1d6   :  { %3723 = vmatmul.mubr.msk.f32.vlgmr.msra.gmra.mxu1 %vm183_vm2, %v164_v45 }
 0x1d7   :  { %3732 = vmatprep.mubr.msk.f32.mxu1 %vm4054_vm1, %v4051_v0 }
 0x21d   :  { %v254_v50 = vpop.f32.mrf.mxu0  ;;  %v330_v51 = vpop.f32.mrf.mxu1 }
 0x21e   :  { %v793_v52 = vsel %vm183_vm2, %v330_v51, -inf  ;;  %v790_v53 = vsel %vm183_vm2, %v254_v50, -inf }
 0x21f   :  { %v3699_v54 = vpop.f32.mrf.mxu1  ;;  %794 = vmax.xlane.f32.xlu1 %v793_v52  ;;  %791 = vmax.xlane.f32.xlu0 %v790_v53  ;;  %v3694_v55 = vpop.f32.mrf.mxu0 }
 0x284   :  { %v406_v56 = vpop.f32.mrf.mxu1 }
 0x285   :  { %v796_v57 = vsel %vm183_vm2, %v406_v56, -inf }
 0x286   :  { %v3704_v58 = vpop.f32.mrf.mxu1  ;;  %797 = vmax.xlane.f32.xlu0 %v796_v57 }
 0x288   :  { %v634_v59 = vpop.f32.mrf.mxu0 }
 0x289   :  { %v805_v11 = vsel %vm183_vm2, %v634_v59, -inf }
 0x28a   :  { %v3719_v60 = vpop.f32.mrf.mxu0 }
 0x28c   :  { %v482_v61 = vpop.f32.mrf.mxu1 }
 0x28d   :  { %v799_v62 = vsel %vm183_vm2, %v482_v61, -inf }
 0x28e   :  { %v786_v63 = vpop.f32.mrf.mxu0  ;;  %v3709_v2 = vpop.f32.mrf.mxu1  ;;  %800 = vmax.xlane.f32.xlu0 %v799_v62 }
 0x28f   :  { %v811_v15 = vsel %vm183_vm2, %v786_v63, -inf }
 0x290   :  { %v3729_v4 = vpop.f32.mrf.mxu0  ;;  %v558_v6 = vpop.f32.mrf.mxu1 }
 0x291   :  { %v802_v8 = vsel %vm183_vm2, %v558_v6, -inf }
 0x292   :  { %803 = vmax.xlane.f32.xlu1 %v802_v8  ;;  %v3714_v13 = vpop.f32.mrf.mxu1  ;;  %806 = vmax.xlane.f32.xlu0 %v805_v11 }
 0x296   :  { %v710_v17 = vpop.f32.mrf.mxu1  ;;  %812 = vmax.xlane.f32.xlu0 %v811_v15 }
 0x297   :  { %v808_v18 = vsel %vm183_vm2, %v710_v17, -inf }
 0x298   :  { %809 = vmax.xlane.f32.xlu1 %v808_v18  ;;  %v3724_v20 = vpop.f32.mrf.mxu1 }
 0x2a8   :  { %v795_v21 = vpop.xlane.xlu1 %794  ;;  %v792_v25 = vpop.xlane.xlu0 %791 }
 0x2a9   :  { %878 = vrot.lane.b32.xlu1 %v4131_v19, %s4057_s26  ;;  %v815_v23 = vsub.f32 %v330_v51, %v795_v21  ;;  %v814_v19 = vsub.f32 %v254_v50, %v792_v25 }
 0x2ab   :  { %v824_v24 = vmul.f32 1.442695, %v815_v23  ;;  %v822_v32 = vmul.f32 1.442695, %v814_v19 }
 0x2ac   :  { %954 = vrot.lane.b32.xlu0 %v4142_v22, %s4057_s26 }
 0x2ad   :  { %1030 = vrot.lane.b32.xlu1 %v4163_v27, %s4057_s26  ;;  %3928 = vpow2.f32 %v824_v24 }
 0x2ae   :  { %3930 = vpow2.f32 %v822_v32 }
 0x2b0   :  { %1182 = vrot.lane.b32.xlu0 %v4161_v26, %s4057_s26 }
 0x2b1   :  { %1106 = vrot.lane.b32.xlu1 %v4169_v29, %s4057_s26 }
 0x2b5   :  { %1258 = vrot.lane.b32.xlu1 %v4167_v28, %s4057_s26 }
 0x2ba   :  { %v4256_v22 = vpop.eup %3928 }
 0x2bb   :  { %v841_v27 = vsel %vm183_vm2, %v4256_v22, 0.0  ;;  %v4260_v26 = vpop.eup %3930 }
 0x2bc   :  { %v838_v29 = vsel %vm183_vm2, %v4260_v26, 0.0 }
 0x2cf   :  { %842 = vadd.xlane.f32.xlu0 %v841_v27 }
 0x2d9   :  { %839 = vadd.xlane.f32.xlu1 %v838_v29 }
 0x30f   :  { %v798_v28 = vpop.xlane.xlu0 %797 }
 0x310   :  { %v816_v33 = vsub.f32 %v406_v56, %v798_v28 }
 0x312   :  { %v826_v34 = vmul.f32 1.442695, %v816_v33 }
 0x314   :  { %3932 = vpow2.f32 %v826_v34 }
 0x317   :  { %v801_v35 = vpop.xlane.xlu0 %800 }
 0x318   :  { %v817_v36 = vsub.f32 %v482_v61, %v801_v35 }
 0x31a   :  { %v828_v37 = vmul.f32 1.442695, %v817_v36 }
 0x31b   :  { %v804_v38 = vpop.xlane.xlu1 %803  ;;  %v807_v39 = vpop.xlane.xlu0 %806 }
 0x31c   :  { %3934 = vpow2.f32 %v828_v37  ;;  %v818_v40 = vsub.f32 %v558_v6, %v804_v38  ;;  %v819_v41 = vsub.f32 %v634_v59, %v807_v39 }
 0x31e   :  { %v830_v42 = vmul.f32 1.442695, %v818_v40  ;;  %v832_v43 = vmul.f32 1.442695, %v819_v41 }
 0x31f   :  { %v813_v44 = vpop.xlane.xlu0 %812 }
 0x320   :  { %3936 = vpow2.f32 %v830_v42  ;;  %v821_v45 = vsub.f32 %v786_v63, %v813_v44 }
 0x321   :  { %v4264_v50 = vpop.eup %3932  ;;  %3938 = vpow2.f32 %v832_v43  ;;  %v810_v51 = vpop.xlane.xlu1 %809 }
 0x322   :  { %v836_v52 = vmul.f32 1.442695, %v821_v45  ;;  %v820_v53 = vsub.f32 %v710_v17, %v810_v51  ;;  %v844_v54 = vsel %vm183_vm2, %v4264_v50, 0.0 }
 0x323   :  { %845 = vadd.xlane.f32.xlu1 %v844_v54  ;;  %v955_v55 = vpop.permute.xlu0 %954 }
 0x324   :  { %3940 = vpow2.f32 %v836_v52  ;;  %v834_v56 = vmul.f32 1.442695, %v820_v53  ;;  %3736 = vmatpush3.msra.mxu0 %v955_v55 }
 0x325   :  { %v879_v57 = vpop.permute.xlu1 %878  ;;  %3745 = vmatprep.subr.mxu0 %v4051_v0 }
 0x326   :  { %3942 = vpow2.f32 %v834_v56  ;;  %3731 = vmatpush3.msra.mxu1 %v879_v57 }
 0x327   :  { %3740 = vmatprep.subr.mxu1 %v4051_v0  ;;  %v1183_v13 = vpop.permute.xlu0 %1182 }
 0x329   :  { %v3935_v58 = vpop.eup %3934  ;;  %v1031_v11 = vpop.permute.xlu1 %1030 }
 0x32a   :  { %v847_v59 = vsel %vm183_vm2, %v3935_v58, 0.0 }
 0x32b   :  { %848 = vadd.xlane.f32.xlu0 %v847_v59 }
 0x32d   :  { %v4271_v60 = vpop.eup %3936  ;;  %v1107_v15 = vpop.permute.xlu1 %1106 }
 0x32e   :  { %v4273_v61 = vpop.eup %3938  ;;  %v850_v62 = vsel %vm183_vm2, %v4271_v60, 0.0 }
 0x32f   :  { %851 = vadd.xlane.f32.xlu1 %v850_v62  ;;  %v853_v63 = vsel %vm183_vm2, %v4273_v61, 0.0 }
 0x330   :  { %854 = vadd.xlane.f32.xlu0 %v853_v63 }
 0x331   :  { %v4279_v2 = vpop.eup %3940  ;;  %v1259_v18 = vpop.permute.xlu1 %1258 }
 0x332   :  { %v859_v4 = vsel %vm183_vm2, %v4279_v2, 0.0 }
 0x333   :  { %v4283_v6 = vpop.eup %3942 }
 0x334   :  { %860 = vadd.xlane.f32.xlu0 %v859_v4  ;;  %v856_v8 = vsel %vm183_vm2, %v4283_v6, 0.0 }
 0x335   :  { %857 = vadd.xlane.f32.xlu1 %v856_v8 }
 0x346   :  { %1410 = vrot.lane.b32.xlu1 %v4175_v30, %s4057_s26 }
 0x34a   :  { %1334 = vrot.lane.b32.xlu0 %v4177_v31, %s4057_s26  ;;  %1531 = vrot.lane.b32.xlu1 %v4086_v3, %s4057_s26 }
 0x34e   :  { %1533 = vrot.lane.b32.xlu0 %v4084_v1, %s4057_s26  ;;  %1529 = vrot.lane.b32.xlu1 %v4089_v5, %s4057_s26 }
 0x358   :  { %v843_v17 = vpop.xlane.xlu0 %842 }
 0x359   :  { %3944 = vrcp.f32 %v843_v17 }
 0x362   :  { %v840_v20 = vpop.xlane.xlu1 %839 }
 0x363   :  { %3946 = vrcp.f32 %v840_v20 }
 0x366   :  { %v3945_v30 = vpop.eup %3944 }
 0x367   :  { %v865_v31 = vmul.f32 %v3945_v30, %v4256_v22 }
 0x369   :  { %3738 = vmatmul.mubr.msk.f32.vlgmr.msra.gmra.mxu0 %vm183_vm2, %v865_v31 }
 0x36a   :  { %3746 = vmatpush3.msra.mxu0 %v1107_v15  ;;  %3747 = vmatprep.mubr.msk.f32.mxu0 %vm4054_vm1, %v4051_v0 }
 0x36b   :  { %3755 = vmatprep.subr.mxu0 %v4051_v0 }
 0x370   :  { %v3947_v21 = vpop.eup %3946 }
 0x371   :  { %v863_v23 = vmul.f32 %v3947_v21, %v4260_v26 }
 0x373   :  { %3733 = vmatmul.mubr.msk.f32.vlgmr.msra.gmra.mxu1 %vm183_vm2, %v863_v23 }
 0x374   :  { %3741 = vmatpush3.msra.mxu1 %v1031_v11  ;;  %3742 = vmatprep.mubr.msk.f32.mxu1 %vm4054_vm1, %v4051_v0 }
 0x375   :  { %3750 = vmatprep.subr.mxu1 %v4051_v0 }
 0x3ac   :  { %v846_v24 = vpop.xlane.xlu1 %845 }
 0x3ad   :  { %3948 = vrcp.f32 %v846_v24 }
 0x3b4   :  { %v849_v25 = vpop.xlane.xlu0 %848 }
 0x3b5   :  { %3950 = vrcp.f32 %v849_v25 }
 0x3b8   :  { %v852_v19 = vpop.xlane.xlu1 %851 }
 0x3b9   :  { %3952 = vrcp.f32 %v852_v19  ;;  %v855_v32 = vpop.xlane.xlu0 %854 }
 0x3ba   :  { %v3949_v22 = vpop.eup %3948  ;;  %3954 = vrcp.f32 %v855_v32 }
 0x3bb   :  { %v867_v27 = vmul.f32 %v3949_v22, %v4264_v50 }
 0x3bd   :  { %v861_v26 = vpop.xlane.xlu0 %860  ;;  %3743 = vmatmul.mubr.msk.f32.vlgmr.msra.gmra.mxu1 %vm183_vm2, %v867_v27 }
 0x3be   :  { %3956 = vrcp.f32 %v861_v26  ;;  %v858_v29 = vpop.xlane.xlu1 %857  ;;  %3751 = vmatpush3.msra.mxu1 %v1183_v13  ;;  %3752 = vmatprep.mubr.msk.f32.mxu1 %vm4054_vm1, %v4051_v0 }
 0x3bf   :  { %3958 = vrcp.f32 %v858_v29  ;;  %3760 = vmatprep.subr.mxu1 %v4051_v0 }
 0x3c1   :  { %v1335_v38 = vpop.permute.xlu0 %1334 }
 0x3c2   :  { %v3951_v28 = vpop.eup %3950  ;;  %v1411_v39 = vpop.permute.xlu1 %1410 }
 0x3c3   :  { %v869_v33 = vmul.f32 %v3951_v28, %v3935_v58 }
 0x3c5   :  { %3748 = vmatmul.mubr.msk.f32.vlgmr.msra.gmra.mxu0 %vm183_vm2, %v869_v33  ;;  %v1534_v44 = vpop.permute.xlu0 %1533 }
 0x3c6   :  { %v3953_v34 = vpop.eup %3952  ;;  %3756 = vmatpush3.msra.mxu0 %v1259_v18  ;;  %3757 = vmatprep.mubr.msk.f32.mxu0 %vm4054_vm1, %v4051_v0  ;;  %v1532_v53 = vpop.permute.xlu1 %1531 }
 0x3c7   :  { %v3955_v35 = vpop.eup %3954  ;;  %3765 = vmatprep.subr.mxu0 %v4051_v0  ;;  %v871_v36 = vmul.f32 %v3953_v34, %v4271_v60 }
 0x3c8   :  { %v873_v37 = vmul.f32 %v3955_v35, %v4273_v61 }
 0x3c9   :  { %3753 = vmatmul.mubr.msk.f32.vlgmr.msra.gmra.mxu1 %vm183_vm2, %v871_v36 }
 0x3ca   :  { %3758 = vmatmul.mubr.msk.f32.vlgmr.msra.gmra.mxu0 %vm183_vm2, %v873_v37  ;;  %3761 = vmatpush3.msra.mxu1 %v1335_v38  ;;  %v1530_v54 = vpop.permute.xlu1 %1529  ;;  %v141_v38 = vadd.f32 %v4228_v46, %v4124_v16 }
 0x3cb   :  { %v3957_v40 = vpop.eup %3956  ;;  %3766 = vmatpush3.msra.mxu0 %v1411_v39  ;;  %3767 = vmatprep.mubr.msk.f32.mxu0 %vm4054_vm1, %v4051_v0  ;;  %v147_v39 = vadd.f32 %v4232_v48, %v4124_v16 }
 0x3cc   :  { %v3959_v41 = vpop.eup %3958  ;;  %3762 = vmatprep.mubr.msk.f32.mxu1 %vm4054_vm1, %v4051_v0  ;;  %v877_v42 = vmul.f32 %v3957_v40, %v4279_v2  ;;  %3770 = vmatprep.subr.mxu1 %v1534_v44 }
 0x3cd   :  { %v875_v43 = vmul.f32 %v3959_v41, %v4283_v6  ;;  %v4335_v6 = vld [vmem:[#allocation2 + $0x68] ss:$0 sm:$0xff] }
 0x3ce   :  { %3768 = vmatmul.mubr.msk.f32.vlgmr.msra.gmra.mxu0 %vm183_vm2, %v877_v42 }
 0x3cf   :  { %3763 = vmatmul.mubr.msk.f32.vlgmr.msra.gmra.mxu1 %vm183_vm2, %v875_v43 }
 0x3d0   :  { %3771 = vmatpush3.msra.mxu1 %v1534_v44 }
 0x3d1   :  { %3772 = vmatprep.subr.mxu1 %v1532_v53 }
 0x3d2   :  { %3773 = vmatpush3.msra.mxu1 %v1532_v53 }
 0x3d3   :  { %3774 = vmatprep.subr.mxu1 %v1530_v54 }
 0x3d4   :  { %3775 = vmatpush3.msra.mxu1 %v1530_v54 }
 0x429   :  { %v1026_v45 = vpop.f32.mrf.mxu0 }
 0x42b   :  { %v3739_v50 = vpop.f32.mrf.mxu0 }
 0x433   :  { %v950_v51 = vpop.f32.mrf.mxu1 }
 0x435   :  { %v3734_v52 = vpop.f32.mrf.mxu1 }
 0x47d   :  { %v1102_v55 = vpop.f32.mrf.mxu1 }
 0x47e   :  { %1488 = vrot.lane.b32.xlu0 %v1102_v55, %s4058_s27 }
 0x47f   :  { %v3744_v56 = vpop.f32.mrf.mxu1 }
 0x485   :  { %v1178_v57 = vpop.f32.mrf.mxu0 }
 0x486   :  { %1490 = vrot.lane.b32.xlu0 %v1178_v57, %s4058_s27 }
 0x487   :  { %v3749_v58 = vpop.f32.mrf.mxu0 }
 0x489   :  { %v1254_v59 = vpop.f32.mrf.mxu1 }
 0x48a   :  { %v1330_v60 = vpop.f32.mrf.mxu0  ;;  %1496 = vrot.lane.b32.xlu1 %v1254_v59, %s4059_s28 }
 0x48b   :  { %1498 = vrot.lane.b32.xlu0 %v1330_v60, %s4059_s28  ;;  %v3754_v61 = vpop.f32.mrf.mxu1 }
 0x48c   :  { %v3759_v62 = vpop.f32.mrf.mxu0 }
 0x48d   :  { %v1626_v62 = vld [vmem:[#allocation2 + $0x62] ss:$0 sm:$0xff] }
 0x48e   :  { %v1482_v63 = vpop.f32.mrf.mxu0 }
 0x48f   :  { %v1406_v2 = vpop.f32.mrf.mxu1  ;;  %1527 = vrot.lane.b32.xlu0 %v4092_v7, %s4057_s26 }
 0x490   :  { %1504 = vrot.lane.b32.xlu1 %v1406_v2, %s4050_s13  ;;  %v3769_v4 = vpop.f32.mrf.mxu0 }
 0x491   :  { %v3764_v8 = vpop.f32.mrf.mxu1 }
 0x493   :  { %1540 = vrot.lane.b32.xlu0 %v4335_v6, %s4057_s26 }
 0x494   :  { %1506 = vrot.lane.b32.xlu1 %v1482_v63, %s4050_s13 }
 0x4f0   :  { %v1489_v11 = vpop.permute.xlu0 %1488 }
 0x4f1   :  { %v1510_v18 = vsel %vm183_vm2, %v950_v51, %v1489_v11  ;;  %v1627_v11 = vld [vmem:[#allocation2 + $0x63] ss:$0 sm:$0xff] }
 0x4f8   :  { %v1491_v13 = vpop.permute.xlu0 %1490 }
 0x4f9   :  { %v1511_v23 = vsel %vm183_vm2, %v1026_v45, %v1491_v13 }
 0x4fc   :  { %v1497_v15 = vpop.permute.xlu1 %1496 }
 0x4fd   :  { %v1499_v17 = vpop.permute.xlu0 %1498  ;;  %v1513_v30 = vsel %vm1512_vm3, %v1510_v18, %v1497_v15 }
 0x4fe   :  { %v1514_v24 = vsel %vm1512_vm3, %v1511_v23, %v1499_v17 }
 0x501   :  { %v1528_v20 = vpop.permute.xlu0 %1527 }
 0x502   :  { %v1505_v31 = vpop.permute.xlu1 %1504  ;;  %3776 = vmatprep.subr.mxu1 %v1528_v20 }
 0x503   :  { %v1516_v21 = vsel %vm1515_vm4, %v1513_v30, %v1505_v31  ;;  %3777 = vmatpush3.msra.mxu1 %v1528_v20 }
 0x504   :  { %3778 = vmatprep.mubr.msk.f32.mxu1 %vm51_vm0, %v1516_v21  ;;  %3792 = vmatprep.subr.mxu1 %v4051_v0 }
 0x505   :  { %v1541_v32 = vpop.permute.xlu0 %1540 }
 0x506   :  { %v1507_v25 = vpop.permute.xlu1 %1506 }
 0x507   :  { %v1517_v19 = vsel %vm1515_vm4, %v1514_v24, %v1507_v25 }
 0x508   :  { %3779 = vmatmul.mubr.msk.f32.vlgmr.msra.gmra.mxu1 %vm51_vm0, %v1517_v19 }
 0x509   :  { %3794 = vmatprep.mubr.msk.f32.mxu1 %vm4054_vm1, %v4051_v0 }
 0x5c8   :  { %v3780_v22 = vpop.f32.mrf.mxu1 }
 0x5c9   :  { %v1621_v27 = vadd.f32 %v3780_v22, %v1541_v32 }
 0x5ca   :  { %v1615_v26 = vpop.f32.mrf.mxu1 }
 0x5cb   :  { %v4352_v29 = vadd.f32 %v1621_v27, %v4108_v10  ;;  %v1616_v28 = vadd.f32 %v1615_v26, %v1541_v32 }
 0x5cd   :  { %v4355_v33 = vadd.f32 %v1616_v28, %v4098_v9  ;;  %v1631_v34 = vsel %vm51_vm0, %v4352_v29, 0.0  ;;  %v1635_v37 = vmul.f32 %v4352_v29, %v4352_v29 }
 0x5ce   :  { %1632 = vadd.xlane.f32.xlu0 %v1631_v34 }
 0x5cf   :  { %v1628_v35 = vsel %vm51_vm0, %v4355_v33, 0.0  ;;  %v1634_v36 = vmul.f32 %v4355_v33, %v4355_v33  ;;  %v1639_v9 = vsel %vm51_vm0, %v1635_v37, 0.0 }
 0x5d0   :  { %1629 = vadd.xlane.f32.xlu1 %v1628_v35 }
 0x5d1   :  { %v1636_v10 = vsel %vm51_vm0, %v1634_v36, 0.0  ;;  %v47_v36 = vsub.s32 1, %v4113_v12 }
 0x5d2   :  { %1637 = vadd.xlane.f32.xlu0 %v1636_v10 }
 0x5d3   :  { %v48_v12 = vrot.slane %v4116_v14, %v47_v36 }
 0x5d4   :  { %1640 = vadd.xlane.f32.xlu1 %v1639_v9 }
 0x5d5   :  { %v4455_v14 = vadd.f32 %v4230_v47, %v48_v12 }
 0x5e5   :  { %1666 = vrot.lane.b32.xlu1 %v4086_v3, %s4056_s25 }
 0x5e8   :  { %1668 = vrot.lane.b32.xlu0 %v4084_v1, %s4056_s25 }
 0x5e9   :  { %1664 = vrot.lane.b32.xlu1 %v4089_v5, %s4056_s25 }
 0x5ec   :  { %1662 = vrot.lane.b32.xlu0 %v4092_v7, %s4056_s25 }
 0x5ed   :  { %1674 = vrot.lane.b32.xlu1 %v4335_v6, %s4056_s25 }
 0x5f0   :  { %1776 = vrot.lane.b32.xlu0 %v141_v38, %s4053_s24 }
 0x5f1   :  { %1778 = vrot.lane.b32.xlu1 %v147_v39, %s4053_s24 }
 0x5f4   :  { %1780 = vrot.lane.b32.xlu0 %v141_v38, %s4052_s23 }
 0x5f5   :  { %1782 = vrot.lane.b32.xlu1 %v147_v39, %s4052_s23 }
 0x5f8   :  { %1784 = vrot.lane.b32.xlu0 %v141_v38, %s4055_s0 }
 0x5f9   :  { %1786 = vrot.lane.b32.xlu1 %v147_v39, %s4055_s0 }
 0x5fc   :  { %1808 = vrot.lane.b32.xlu0 %v141_v38, %s4060_s29  ;;  %v4447_v38 = vadd.f32 %v4234_v49, %v48_v12 }
 0x5fd   :  { %1884 = vrot.lane.b32.xlu1 %v147_v39, %s4060_s29 }
 0x657   :  { %v1633_v1 = vpop.xlane.xlu0 %1632 }
 0x658   :  { %v1643_v5 = vmul.f32 0.03125, %v1633_v1 }
 0x659   :  { %v1630_v3 = vpop.xlane.xlu1 %1629 }
 0x65a   :  { %v1642_v7 = vmul.f32 0.03125, %v1630_v3  ;;  %v1647_v41 = vmul.f32 %v1643_v5, %v1643_v5  ;;  %v1651_v63 = vsub.f32 %v4352_v29, %v1643_v5 }
 0x65b   :  { %v1638_v16 = vpop.xlane.xlu0 %1637 }
 0x65c   :  { %v1646_v46 = vmul.f32 %v1642_v7, %v1642_v7  ;;  %v1644_v48 = vmul.f32 0.03125, %v1638_v16  ;;  %v1650_v59 = vsub.f32 %v4355_v33, %v1642_v7 }
 0x65d   :  { %v1641_v40 = vpop.xlane.xlu1 %1640 }
 0x65e   :  { %v1648_v42 = vsub.f32 %v1644_v48, %v1646_v46  ;;  %v1645_v43 = vmul.f32 0.03125, %v1641_v40 }
 0x65f   :  { %v1669_v44 = vpop.permute.xlu0 %1668 }
 0x660   :  { %v1652_v45 = vadd.f32 1e-05, %v1648_v42  ;;  %v1649_v50 = vsub.f32 %v1645_v43, %v1647_v41  ;;  %3781 = vmatprep.subr.mxu0 %v1669_v44 }
 0x661   :  { %v1667_v51 = vpop.permute.xlu1 %1666  ;;  %3782 = vmatpush3.msra.mxu0 %v1669_v44 }
 0x662   :  { %3960 = vrsqrt.f32 %v1652_v45  ;;  %v1653_v52 = vadd.f32 1e-05, %v1649_v50  ;;  %3783 = vmatprep.subr.mxu0 %v1667_v51 }
 0x663   :  { %v1663_v53 = vpop.permute.xlu0 %1662  ;;  %3784 = vmatpush3.msra.mxu0 %v1667_v51 }
 0x664   :  { %3962 = vrsqrt.f32 %v1653_v52 }
 0x665   :  { %v1665_v54 = vpop.permute.xlu1 %1664 }
 0x666   :  { %3785 = vmatprep.subr.mxu0 %v1665_v54 }
 0x667   :  { %v1777_v55 = vpop.permute.xlu0 %1776  ;;  %3786 = vmatpush3.msra.mxu0 %v1665_v54 }
 0x668   :  { %1960 = vrot.lane.b32.xlu0 %v1777_v55, %s4060_s29  ;;  %3787 = vmatprep.subr.mxu0 %v1663_v53 }
 0x669   :  { %v1675_v56 = vpop.permute.xlu1 %1674  ;;  %3788 = vmatpush3.msra.mxu0 %v1663_v53 }
 0x66a   :  { %3797 = vmatprep.subr.mxu0 %v4051_v0 }
 0x66b   :  { %v1781_v57 = vpop.permute.xlu0 %1780 }
 0x66c   :  { %2112 = vrot.lane.b32.xlu0 %v1781_v57, %s4060_s29 }
 0x66d   :  { %v1779_v58 = vpop.permute.xlu1 %1778 }
 0x66e   :  { %2036 = vrot.lane.b32.xlu1 %v1779_v58, %s4060_s29 }
 0x66f   :  { %v3961_v60 = vpop.eup %3960  ;;  %v1785_v61 = vpop.permute.xlu0 %1784 }
 0x670   :  { %2264 = vrot.lane.b32.xlu0 %v1785_v61, %s4060_s29  ;;  %v1656_v2 = vmul.f32 %v3961_v60, %v1650_v59 }
 0x671   :  { %v3963_v4 = vpop.eup %3962  ;;  %v1783_v8 = vpop.permute.xlu1 %1782 }
 0x672   :  { %2188 = vrot.lane.b32.xlu1 %v1783_v8, %s4060_s29  ;;  %v1657_v13 = vmul.f32 %v3963_v4, %v1651_v63  ;;  %v1658_v15 = vmul.f32 %v1656_v2, %v1626_v62 }
 0x673   :  { %v1809_v17 = vpop.permute.xlu0 %1808 }
 0x674   :  { %3793 = vmatpush3.xpose.msk.msra.mxu1 %vm183_vm2, %v1809_v17  ;;  %v1659_v18 = vmul.f32 %v1657_v13, %v1626_v62  ;;  %v4398_v20 = vadd.f32 %v1658_v15, %v1627_v11 }
 0x675   :  { %v1787_v30 = vpop.permute.xlu1 %1786  ;;  %3802 = vmatprep.subr.mxu1 %v4051_v0 }
 0x676   :  { %v4401_v31 = vadd.f32 %v1659_v18, %v1627_v11  ;;  %3789 = vmatprep.mubr.msk.f32.mxu0 %vm51_vm0, %v4398_v20  ;;  %2340 = vrot.lane.b32.xlu1 %v1787_v30, %s4060_s29 }
 0x678   :  { %3790 = vmatmul.mubr.msk.f32.vlgmr.msra.gmra.mxu0 %vm51_vm0, %v4401_v31 }
 0x679   :  { %v1885_v21 = vpop.permute.xlu1 %1884  ;;  %3799 = vmatprep.mubr.msk.f32.mxu0 %vm4054_vm1, %v4051_v0 }
 0x67a   :  { %3798 = vmatpush3.xpose.msk.msra.mxu0 %vm183_vm2, %v1885_v21 }
 0x67b   :  { %3807 = vmatprep.subr.mxu0 %v4051_v0 }
 0x6da   :  { %v1961_v26 = vpop.permute.xlu0 %1960 }
 0x6de   :  { %v2113_v28 = vpop.permute.xlu0 %2112 }
 0x6e0   :  { %v2037_v22 = vpop.permute.xlu1 %2036 }
 0x6e2   :  { %v2265_v34 = vpop.permute.xlu0 %2264 }
 0x6e4   :  { %v2189_v29 = vpop.permute.xlu1 %2188 }
 0x6e8   :  { %v2341_v33 = vpop.permute.xlu1 %2340 }
 0x738   :  { %v3791_v23 = vpop.f32.mrf.mxu0 }
 0x739   :  { %v1755_v24 = vadd.f32 %v3791_v23, %v1675_v56 }
 0x73a   :  { %v1749_v25 = vpop.f32.mrf.mxu0 }
 0x73b   :  { %v1759_v19 = vmul.f32 0.35355338, %v1755_v24  ;;  %v1750_v32 = vadd.f32 %v1749_v25, %v1675_v56 }
 0x73d   :  { %v1758_v27 = vmul.f32 0.35355338, %v1750_v32  ;;  %1764 = vrot.lane.b32.xlu1 %v1759_v19, %s4053_s24  ;;  %3800 = vmatmul.mubr.msk.f32.vlgmr.msra.gmra.mxu0 %vm183_vm2, %v1759_v19 }
 0x73e   :  { %3808 = vmatpush3.xpose.msk.msra.mxu0 %vm183_vm2, %v2037_v22  ;;  %3809 = vmatprep.mubr.msk.f32.mxu0 %vm4054_vm1, %v4051_v0 }
 0x73f   :  { %1762 = vrot.lane.b32.xlu0 %v1758_v27, %s4053_s24  ;;  %3795 = vmatmul.mubr.msk.f32.vlgmr.msra.gmra.mxu1 %vm183_vm2, %v1758_v27 }
 0x740   :  { %3803 = vmatpush3.xpose.msk.msra.mxu1 %vm183_vm2, %v1961_v26  ;;  %3817 = vmatprep.subr.mxu0 %v4051_v0 }
 0x741   :  { %1768 = vrot.lane.b32.xlu1 %v1759_v19, %s4052_s23  ;;  %3804 = vmatprep.mubr.msk.f32.mxu1 %vm4054_vm1, %v4051_v0 }
 0x742   :  { %3812 = vmatprep.subr.mxu1 %v4051_v0 }
 0x743   :  { %1766 = vrot.lane.b32.xlu0 %v1758_v27, %s4052_s23 }
 0x745   :  { %1772 = vrot.lane.b32.xlu1 %v1759_v19, %s4055_s0 }
 0x747   :  { %1770 = vrot.lane.b32.xlu0 %v1758_v27, %s4055_s0 }
 0x7af   :  { %v1765_v35 = vpop.permute.xlu1 %1764 }
 0x7b0   :  { %3810 = vmatmul.mubr.msk.f32.vlgmr.msra.gmra.mxu0 %vm183_vm2, %v1765_v35 }
 0x7b1   :  { %3818 = vmatpush3.xpose.msk.msra.mxu0 %vm183_vm2, %v2189_v29  ;;  %v1763_v37 = vpop.permute.xlu0 %1762  ;;  %3819 = vmatprep.mubr.msk.f32.mxu0 %vm4054_vm1, %v4051_v0 }
 0x7b2   :  { %3805 = vmatmul.mubr.msk.f32.vlgmr.msra.gmra.mxu1 %vm183_vm2, %v1763_v37  ;;  %3827 = vmatprep.subr.mxu0 %v4051_v0 }
 0x7b3   :  { %3813 = vmatpush3.xpose.msk.msra.mxu1 %vm183_vm2, %v2113_v28  ;;  %v1769_v10 = vpop.permute.xlu1 %1768  ;;  %3814 = vmatprep.mubr.msk.f32.mxu1 %vm4054_vm1, %v4051_v0 }
 0x7b4   :  { %3820 = vmatmul.mubr.msk.f32.vlgmr.msra.gmra.mxu0 %vm183_vm2, %v1769_v10  ;;  %3822 = vmatprep.subr.mxu1 %v4051_v0 }
 0x7b5   :  { %3828 = vmatpush3.xpose.msk.msra.mxu0 %vm183_vm2, %v2341_v33  ;;  %v1767_v9 = vpop.permute.xlu0 %1766  ;;  %3829 = vmatprep.mubr.msk.f32.mxu0 %vm4054_vm1, %v4051_v0 }
 0x7b6   :  { %3815 = vmatmul.mubr.msk.f32.vlgmr.msra.gmra.mxu1 %vm183_vm2, %v1767_v9  ;;  %3837 = vmatprep.subr.mxu0 %v4051_v0 }
 0x7b7   :  { %3823 = vmatpush3.xpose.msk.msra.mxu1 %vm183_vm2, %v2265_v34  ;;  %v1773_v39 = vpop.permute.xlu1 %1772  ;;  %3824 = vmatprep.mubr.msk.f32.mxu1 %vm4054_vm1, %v4051_v0 }
 0x7b8   :  { %3830 = vmatmul.mubr.msk.f32.vlgmr.msra.gmra.mxu0 %vm183_vm2, %v1773_v39  ;;  %3832 = vmatprep.subr.mxu1 %v4051_v0 }
 0x7b9   :  { %3838 = vmatpush3.msra.mxu0 %v4447_v38  ;;  %v1771_v1 = vpop.permute.xlu0 %1770  ;;  %3839 = vmatprep.mubr.msk.f32.mxu0 %vm4054_vm1, %v4051_v0 }
 0x7ba   :  { %3825 = vmatmul.mubr.msk.f32.vlgmr.msra.gmra.mxu1 %vm183_vm2, %v1771_v1  ;;  %3847 = vmatprep.subr.mxu0 %v4051_v0 }
 0x7bb   :  { %3833 = vmatpush3.msra.mxu1 %v4455_v14  ;;  %3834 = vmatprep.mubr.msk.f32.mxu1 %vm4054_vm1, %v4051_v0 }
 0x7bc   :  { %3842 = vmatprep.subr.mxu1 %v4051_v0 }
 0x7fd   :  { %v1956_v49 = vpop.f32.mrf.mxu0 }
 0x7fe   :  { %v2419_v47 = vsel %vm183_vm2, %v1956_v49, -inf }
 0x7ff   :  { %2420 = vmax.xlane.f32.xlu1 %v2419_v47  ;;  %v1880_v3 = vpop.f32.mrf.mxu1  ;;  %v3801_v5 = vpop.f32.mrf.mxu0 }
 0x800   :  { %v2416_v7 = vsel %vm183_vm2, %v1880_v3, -inf }
 0x801   :  { %2417 = vmax.xlane.f32.xlu0 %v2416_v7  ;;  %v3796_v16 = vpop.f32.mrf.mxu1 }
 0x870   :  { %v2108_v46 = vpop.f32.mrf.mxu0 }
 0x871   :  { %v2425_v50 = vsel %vm183_vm2, %v2108_v46, -inf }
 0x872   :  { %v2032_v48 = vpop.f32.mrf.mxu1  ;;  %v3811_v40 = vpop.f32.mrf.mxu0 }
 0x873   :  { %v2422_v41 = vsel %vm183_vm2, %v2032_v48, -inf }
 0x874   :  { %v2260_v42 = vpop.f32.mrf.mxu0  ;;  %2423 = vmax.xlane.f32.xlu0 %v2422_v41  ;;  %v3806_v43 = vpop.f32.mrf.mxu1 }
 0x875   :  { %v2431_v56 = vsel %vm183_vm2, %v2260_v42, -inf }
 0x876   :  { %v2184_v44 = vpop.f32.mrf.mxu1  ;;  %v3821_v45 = vpop.f32.mrf.mxu0 }
 0x877   :  { %v2428_v51 = vsel %vm183_vm2, %v2184_v44, -inf }
 0x878   :  { %v2412_v52 = vpop.f32.mrf.mxu0  ;;  %2426 = vmax.xlane.f32.xlu0 %v2425_v50  ;;  %2429 = vmax.xlane.f32.xlu1 %v2428_v51  ;;  %v3816_v53 = vpop.f32.mrf.mxu1  ;;  %v3121_v51 = vld [vmem:[#allocation2 + $0x50] sm:$0xff] }
 0x879   :  { %v2437_v59 = vsel %vm183_vm2, %v2412_v52, -inf }
 0x87a   :  { %v2336_v54 = vpop.f32.mrf.mxu1  ;;  %v3831_v55 = vpop.f32.mrf.mxu0 }
 0x87b   :  { %v2434_v57 = vsel %vm183_vm2, %v2336_v54, -inf }
 0x87c   :  { %2432 = vmax.xlane.f32.xlu0 %v2431_v56  ;;  %2435 = vmax.xlane.f32.xlu1 %v2434_v57  ;;  %v3826_v58 = vpop.f32.mrf.mxu1 }
 0x880   :  { %2438 = vmax.xlane.f32.xlu0 %v2437_v59 }
 0x888   :  { %v2421_v60 = vpop.xlane.xlu1 %2420 }
 0x889   :  { %v2441_v61 = vsub.f32 %v1956_v49, %v2421_v60 }
 0x88a   :  { %v2418_v62 = vpop.xlane.xlu0 %2417 }
 0x88b   :  { %v2450_v63 = vmul.f32 1.442695, %v2441_v61  ;;  %v2440_v2 = vsub.f32 %v1880_v3, %v2418_v62 }
 0x88d   :  { %1790 = vrot.lane.b32.xlu1 %v4455_v14, %s4053_s24  ;;  %3964 = vpow2.f32 %v2450_v63  ;;  %v2448_v4 = vmul.f32 1.442695, %v2440_v2 }
 0x88f   :  { %3966 = vpow2.f32 %v2448_v4 }
 0x891   :  { %1796 = vrot.lane.b32.xlu1 %v4455_v14, %s4052_s23 }
 0x895   :  { %1798 = vrot.lane.b32.xlu1 %v4447_v38, %s4052_s23 }
 0x896   :  { %1792 = vrot.lane.b32.xlu0 %v4447_v38, %s4053_s24 }
 0x89a   :  { %v3965_v8 = vpop.eup %3964 }
 0x89b   :  { %v2467_v11 = vsel %vm183_vm2, %v3965_v8, 0.0 }
 0x89c   :  { %v3967_v13 = vpop.eup %3966 }
 0x89d   :  { %v2464_v15 = vsel %vm183_vm2, %v3967_v13, 0.0 }
 0x8b5   :  { %2468 = vadd.xlane.f32.xlu0 %v2467_v11 }
 0x8b9   :  { %2465 = vadd.xlane.f32.xlu1 %v2464_v15 }
 0x8fd   :  { %v2424_v17 = vpop.xlane.xlu0 %2423 }
 0x8fe   :  { %v2442_v18 = vsub.f32 %v2032_v48, %v2424_v17 }
 0x900   :  { %v2452_v30 = vmul.f32 1.442695, %v2442_v18 }
 0x901   :  { %v2427_v21 = vpop.xlane.xlu0 %2426  ;;  %v2430_v23 = vpop.xlane.xlu1 %2429 }
 0x902   :  { %3968 = vpow2.f32 %v2452_v30  ;;  %v2443_v24 = vsub.f32 %v2108_v46, %v2427_v21  ;;  %v2444_v25 = vsub.f32 %v2184_v44, %v2430_v23  ;;  %v3119_v30 = vld [vmem:[#allocation2 + $0x20] sm:$0xff] }
 0x904   :  { %v2454_v19 = vmul.f32 1.442695, %v2443_v24  ;;  %v2456_v32 = vmul.f32 1.442695, %v2444_v25 }
 0x905   :  { %v2433_v22 = vpop.xlane.xlu0 %2432  ;;  %v2436_v27 = vpop.xlane.xlu1 %2435 }
 0x906   :  { %3970 = vpow2.f32 %v2454_v19  ;;  %v2445_v26 = vsub.f32 %v2260_v42, %v2433_v22  ;;  %v2446_v29 = vsub.f32 %v2336_v54, %v2436_v27 }
 0x907   :  { %3972 = vpow2.f32 %v2456_v32 }
 0x908   :  { %v2458_v28 = vmul.f32 1.442695, %v2445_v26  ;;  %v2460_v33 = vmul.f32 1.442695, %v2446_v29 }
 0x909   :  { %v2439_v34 = vpop.xlane.xlu0 %2438  ;;  %v1791_v46 = vpop.permute.xlu1 %1790 }
 0x90a   :  { %3974 = vpow2.f32 %v2458_v28  ;;  %v2447_v35 = vsub.f32 %v2412_v52, %v2439_v34 }
 0x90b   :  { %3976 = vpow2.f32 %v2460_v33 }
 0x90c   :  { %v2462_v36 = vmul.f32 1.442695, %v2447_v35 }
 0x90d   :  { %v1797_v48 = vpop.permute.xlu1 %1796  ;;  %v1793_v40 = vpop.permute.xlu0 %1792 }
 0x90e   :  { %3978 = vpow2.f32 %v2462_v36 }
 0x90f   :  { %v3969_v37 = vpop.eup %3968 }
 0x910   :  { %v2470_v10 = vsel %vm183_vm2, %v3969_v37, 0.0 }
 0x911   :  { %2471 = vadd.xlane.f32.xlu1 %v2470_v10  ;;  %v1799_v41 = vpop.permute.xlu1 %1798 }
 0x913   :  { %v3971_v12 = vpop.eup %3970 }
 0x914   :  { %v3973_v9 = vpop.eup %3972  ;;  %v2473_v39 = vsel %vm183_vm2, %v3971_v12, 0.0 }
 0x915   :  { %2474 = vadd.xlane.f32.xlu0 %v2473_v39  ;;  %v2476_v1 = vsel %vm183_vm2, %v3973_v9, 0.0 }
 0x916   :  { %2477 = vadd.xlane.f32.xlu1 %v2476_v1 }
 0x917   :  { %v4487_v49 = vpop.eup %3974 }
 0x918   :  { %v4489_v47 = vpop.eup %3976  ;;  %v2479_v3 = vsel %vm183_vm2, %v4487_v49, 0.0 }
 0x919   :  { %2480 = vadd.xlane.f32.xlu0 %v2479_v3  ;;  %v2482_v5 = vsel %vm183_vm2, %v4489_v47, 0.0 }
 0x91a   :  { %2483 = vadd.xlane.f32.xlu1 %v2482_v5 }
 0x91b   :  { %v4495_v7 = vpop.eup %3978 }
 0x91c   :  { %v2485_v16 = vsel %vm183_vm2, %v4495_v7, 0.0 }
 0x91d   :  { %2486 = vadd.xlane.f32.xlu0 %v2485_v16 }
 0x92b   :  { %1804 = vrot.lane.b32.xlu1 %v4447_v38, %s4055_s0 }
 0x933   :  { %1802 = vrot.lane.b32.xlu0 %v4455_v14, %s4055_s0  ;;  %v3120_v14 = vld [vmem:[#allocation2 + $0x38] sm:$0xff] }
 0x934   :  { %3131 = vrot.lane.b32.xlu1 %v3120_v14, %s4060_s29 }
 0x937   :  { %3133 = vrot.lane.b32.xlu0 %v3121_v51, %s4060_s29 }
 0x938   :  { %3129 = vrot.lane.b32.xlu1 %v3119_v30, %s4060_s29 }
 0x93e   :  { %v2469_v42 = vpop.xlane.xlu0 %2468 }
 0x93f   :  { %3980 = vrcp.f32 %v2469_v42 }
 0x942   :  { %v2466_v43 = vpop.xlane.xlu1 %2465 }
 0x943   :  { %3982 = vrcp.f32 %v2466_v43 }
 0x94c   :  { %v3981_v44 = vpop.eup %3980 }
 0x94d   :  { %v2491_v45 = vmul.f32 %v3981_v44, %v3965_v8 }
 0x94f   :  { %3840 = vmatmul.mubr.msk.f32.vlgmr.msra.gmra.mxu0 %vm183_vm2, %v2491_v45 }
 0x950   :  { %v3983_v50 = vpop.eup %3982  ;;  %3848 = vmatpush3.msra.mxu0 %v1793_v40  ;;  %3849 = vmatprep.mubr.msk.f32.mxu0 %vm4054_vm1, %v4051_v0 }
 0x951   :  { %v2489_v38 = vmul.f32 %v3983_v50, %v3967_v13  ;;  %3857 = vmatprep.subr.mxu0 %v4051_v0 }
 0x953   :  { %3835 = vmatmul.mubr.msk.f32.vlgmr.msra.gmra.mxu1 %vm183_vm2, %v2489_v38 }
 0x954   :  { %3843 = vmatpush3.msra.mxu1 %v1791_v46  ;;  %3844 = vmatprep.mubr.msk.f32.mxu1 %vm4054_vm1, %v4051_v0 }
 0x955   :  { %3852 = vmatprep.subr.mxu1 %v4051_v0 }
 0x99a   :  { %v2472_v52 = vpop.xlane.xlu1 %2471 }
 0x99b   :  { %3984 = vrcp.f32 %v2472_v52 }
 0x99e   :  { %v2475_v53 = vpop.xlane.xlu0 %2474 }
 0x99f   :  { %3986 = vrcp.f32 %v2475_v53  ;;  %v2478_v54 = vpop.xlane.xlu1 %2477 }
 0x9a0   :  { %3988 = vrcp.f32 %v2478_v54 }
 0x9a2   :  { %v2481_v55 = vpop.xlane.xlu0 %2480 }
 0x9a3   :  { %3990 = vrcp.f32 %v2481_v55  ;;  %v2484_v56 = vpop.xlane.xlu1 %2483  ;;  %v3265_v55 = vld [vmem:[#allocation2 + $0x58] sm:$0xff] }
 0x9a4   :  { %3992 = vrcp.f32 %v2484_v56  ;;  %v3264_v56 = vld [vmem:[#allocation2 + $0x40] sm:$0xff] }
 0x9a6   :  { %v2487_v57 = vpop.xlane.xlu0 %2486 }
 0x9a7   :  { %3994 = vrcp.f32 %v2487_v57  ;;  %v1805_v15 = vpop.permute.xlu1 %1804  ;;  %v3263_v57 = vld [vmem:[#allocation2 + $0x28] sm:$0xff] }
 0x9a8   :  { %v3985_v58 = vpop.eup %3984 }
 0x9a9   :  { %v2493_v59 = vmul.f32 %v3985_v58, %v3969_v37  ;;  %v3262_v58 = vld [vmem:[#allocation2 + $0x10] sm:$0xff] }
 0x9aa   :  { %v1803_v4 = vpop.permute.xlu0 %1802 }
 0x9ab   :  { %3845 = vmatmul.mubr.msk.f32.vlgmr.msra.gmra.mxu1 %vm183_vm2, %v2493_v59  ;;  %v3132_v23 = vpop.permute.xlu1 %3131  ;;  %v3357_v59 = vld [vmem:[#allocation2 + $0xb8] sm:$0xff] }
 0x9ac   :  { %v3987_v60 = vpop.eup %3986  ;;  %3853 = vmatpush3.msra.mxu1 %v1797_v48  ;;  %3854 = vmatprep.mubr.msk.f32.mxu1 %vm4054_vm1, %v4051_v0 }
 0x9ad   :  { %v3989_v61 = vpop.eup %3988  ;;  %3862 = vmatprep.subr.mxu1 %v4051_v0  ;;  %v2495_v62 = vmul.f32 %v3987_v60, %v3971_v12  ;;  %v3356_v60 = vld [vmem:[#allocation2 + $0xa0] sm:$0xff] }
 0x9ae   :  { %v2497_v63 = vmul.f32 %v3989_v61, %v3973_v9  ;;  %v3134_v21 = vpop.permute.xlu0 %3133  ;;  %v3118_v9 = vld [vmem:[#allocation2 + $0x8] sm:$0xff] }
 0x9af   :  { %3850 = vmatmul.mubr.msk.f32.vlgmr.msra.gmra.mxu0 %vm183_vm2, %v2495_v62  ;;  %v3130_v22 = vpop.permute.xlu1 %3129  ;;  %v3355_v61 = vld [vmem:[#allocation2 + $0x88] sm:$0xff]  ;;  %v3354_v62 = vld [vmem:[#allocation2 + $0x70] sm:$0xff] }
 0x9b0   :  { %v3991_v2 = vpop.eup %3990  ;;  %3855 = vmatmul.mubr.msk.f32.vlgmr.msra.gmra.mxu1 %vm183_vm2, %v2497_v63  ;;  %3858 = vmatpush3.msra.mxu0 %v1799_v41 }
 0x9b1   :  { %v3993_v8 = vpop.eup %3992  ;;  %3863 = vmatpush3.msra.mxu1 %v1803_v4  ;;  %3859 = vmatprep.mubr.msk.f32.mxu0 %vm4054_vm1, %v4051_v0  ;;  %v2499_v11 = vmul.f32 %v3991_v2, %v4487_v49 }
 0x9b2   :  { %3864 = vmatprep.mubr.msk.f32.mxu1 %vm4054_vm1, %v4051_v0  ;;  %3867 = vmatprep.subr.mxu0 %v4051_v0  ;;  %v2501_v13 = vmul.f32 %v3993_v8, %v4489_v47 }
 0x9b3   :  { %3860 = vmatmul.mubr.msk.f32.vlgmr.msra.gmra.mxu0 %vm183_vm2, %v2499_v11  ;;  %3872 = vmatprep.subr.mxu1 %v3134_v21 }
 0x9b4   :  { %v3995_v17 = vpop.eup %3994  ;;  %3865 = vmatmul.mubr.msk.f32.vlgmr.msra.gmra.mxu1 %vm183_vm2, %v2501_v13  ;;  %3868 = vmatpush3.msra.mxu0 %v1805_v15 }
 0x9b5   :  { %3869 = vmatprep.mubr.msk.f32.mxu0 %vm4054_vm1, %v4051_v0  ;;  %v2503_v18 = vmul.f32 %v3995_v17, %v4495_v7  ;;  %3873 = vmatpush3.msra.mxu1 %v3134_v21 }
 0x9b6   :  { %3874 = vmatprep.subr.mxu1 %v3132_v23  ;;  %3883 = vmatprep.subr.mxu0 %v3265_v55 }
 0x9b7   :  { %3870 = vmatmul.mubr.msk.f32.vlgmr.msra.gmra.mxu0 %vm183_vm2, %v2503_v18  ;;  %3875 = vmatpush3.msra.mxu1 %v3132_v23 }
 0x9b8   :  { %3876 = vmatprep.subr.mxu1 %v3130_v22  ;;  %3884 = vmatpush3.msra.mxu0 %v3265_v55 }
 0x9b9   :  { %3877 = vmatpush3.msra.mxu1 %v3130_v22  ;;  %3885 = vmatprep.subr.mxu0 %v3264_v56 }
 0x9ba   :  { %3886 = vmatpush3.msra.mxu0 %v3264_v56 }
 0x9bb   :  { %3887 = vmatprep.subr.mxu0 %v3263_v57 }
 0x9bc   :  { %3888 = vmatpush3.msra.mxu0 %v3263_v57 }
 0x9bd   :  { %3889 = vmatprep.subr.mxu0 %v3262_v58 }
 0x9be   :  { %3890 = vmatpush3.msra.mxu0 %v3262_v58 }
 0xa0f   :  { %v2646_v24 = vpop.f32.mrf.mxu0 }
 0xa11   :  { %v3841_v25 = vpop.f32.mrf.mxu0 }
 0xa13   :  { %v2573_v19 = vpop.f32.mrf.mxu1 }
 0xa15   :  { %v3836_v32 = vpop.f32.mrf.mxu1 }
 0xa6b   :  { %v2719_v0 = vpop.f32.mrf.mxu1 }
 0xa6d   :  { %v3846_v27 = vpop.f32.mrf.mxu1 }
 0xa6e   :  { %v3226_v27 = vld [vmem:[#allocation2 + $0x64] ss:$0 sm:$0xff] }
 0xa6f   :  { %v2792_v26 = vpop.f32.mrf.mxu0 }
 0xa70   :  { %v2865_v29 = vpop.f32.mrf.mxu1  ;;  %3092 = vrot.lane.b32.xlu0 %v2792_v26, %s4058_s27 }
 0xa71   :  { %3098 = vrot.lane.b32.xlu1 %v2865_v29, %s4059_s28  ;;  %v3851_v28 = vpop.f32.mrf.mxu0 }
 0xa72   :  { %v3856_v33 = vpop.f32.mrf.mxu1 }
 0xa73   :  { %v2938_v34 = vpop.f32.mrf.mxu0 }
 0xa74   :  { %v3011_v35 = vpop.f32.mrf.mxu1  ;;  %3090 = vrot.lane.b32.xlu0 %v2719_v0, %s4058_s27 }
 0xa75   :  { %3106 = vrot.lane.b32.xlu1 %v3011_v35, %s4050_s13  ;;  %v3861_v36 = vpop.f32.mrf.mxu0  ;;  %v3227_v35 = vld [vmem:[#allocation2 + $0x65] ss:$0 sm:$0xff] }
 0xa76   :  { %v3866_v37 = vpop.f32.mrf.mxu1 }
 0xa77   :  { %v3084_v10 = vpop.f32.mrf.mxu0 }
 0xa78   :  { %3100 = vrot.lane.b32.xlu0 %v2938_v34, %s4059_s28 }
 0xa79   :  { %3108 = vrot.lane.b32.xlu1 %v3084_v10, %s4050_s13  ;;  %v3871_v12 = vpop.f32.mrf.mxu0 }
 0xa7c   :  { %3127 = vrot.lane.b32.xlu0 %v3118_v9, %s4060_s29 }
 0xa80   :  { %3140 = vrot.lane.b32.xlu0 %v4335_v6, %s4060_s29 }
 0xae2   :  { %v3093_v39 = vpop.permute.xlu0 %3092 }
 0xae3   :  { %v3099_v1 = vpop.permute.xlu1 %3098  ;;  %v3113_v46 = vsel %vm183_vm2, %v2646_v24, %v3093_v39 }
 0xae6   :  { %v3091_v49 = vpop.permute.xlu0 %3090 }
 0xae7   :  { %v3112_v47 = vsel %vm183_vm2, %v2573_v19, %v3091_v49  ;;  %v3107_v3 = vpop.permute.xlu1 %3106 }
 0xae8   :  { %v3114_v5 = vsel %vm1512_vm3, %v3112_v47, %v3099_v1 }
 0xae9   :  { %v3116_v7 = vsel %vm1515_vm4, %v3114_v5, %v3107_v3  ;;  %v3266_v3 = vld [vmem:[#allocation2 + $0x70] ss:$0 sm:$0xff] }
 0xaea   :  { %v3101_v16 = vpop.permute.xlu0 %3100  ;;  %3880 = vmatprep.mubr.msk.f32.mxu1 %vm51_vm0, %v3116_v7 }
 0xaeb   :  { %v3115_v48 = vsel %vm1512_vm3, %v3113_v46, %v3101_v16  ;;  %v3109_v40 = vpop.permute.xlu1 %3108 }
 0xaec   :  { %v3117_v6 = vsel %vm1515_vm4, %v3115_v48, %v3109_v40 }
 0xaee   :  { %v3128_v41 = vpop.permute.xlu0 %3127 }
 0xaef   :  { %3878 = vmatprep.subr.mxu1 %v3128_v41 }
 0xaf0   :  { %3879 = vmatpush3.msra.mxu1 %v3128_v41  ;;  %v3358_v41 = vld [vmem:[#allocation2 + $0x61] ss:$0 sm:$0xff] }
 0xaf1   :  { %3881 = vmatmul.mubr.msk.f32.vlgmr.msra.gmra.mxu1 %vm51_vm0, %v3117_v6 }
 0xaf2   :  { %v3141_v42 = vpop.permute.xlu0 %3140 }
 0xbb1   :  { %v3882_v43 = vpop.f32.mrf.mxu1 }
 0xbb2   :  { %v3221_v44 = vadd.f32 %v3882_v43, %v3141_v42 }
 0xbb3   :  { %v3215_v45 = vpop.f32.mrf.mxu1 }
 0xbb4   :  { %v4551_v50 = vadd.f32 %v3221_v44, %v4401_v31  ;;  %v3216_v38 = vadd.f32 %v3215_v45, %v3141_v42 }
 0xbb6   :  { %v4554_v14 = vadd.f32 %v3216_v38, %v4398_v20  ;;  %v3231_v51 = vsel %vm51_vm0, %v4551_v50, 0.0  ;;  %v3235_v54 = vmul.f32 %v4551_v50, %v4551_v50 }
 0xbb7   :  { %3232 = vadd.xlane.f32.xlu0 %v3231_v51 }
 0xbb8   :  { %v3228_v52 = vsel %vm51_vm0, %v4554_v14, 0.0  ;;  %v3234_v53 = vmul.f32 %v4554_v14, %v4554_v14  ;;  %v3239_v20 = vsel %vm51_vm0, %v3235_v54, 0.0 }
 0xbb9   :  { %3229 = vadd.xlane.f32.xlu1 %v3228_v52 }
 0xbba   :  { %v3236_v31 = vsel %vm51_vm0, %v3234_v53, 0.0 }
 0xbbb   :  { %3237 = vadd.xlane.f32.xlu0 %v3236_v31 }
 0xbbd   :  { %3240 = vadd.xlane.f32.xlu1 %v3239_v20 }
 0xbce   :  { %3379 = vrot.lane.b32.xlu1 %v3356_v60, %s4057_s26 }
 0xbd1   :  { %3381 = vrot.lane.b32.xlu0 %v3357_v59, %s4057_s26 }
 0xbd2   :  { %3377 = vrot.lane.b32.xlu1 %v3355_v61, %s4057_s26 }
 0xbd5   :  { %3375 = vrot.lane.b32.xlu0 %v3354_v62, %s4057_s26 }
 0xbd6   :  { %3373 = vrot.lane.b32.xlu1 %v3265_v55, %s4057_s26 }
 0xbd9   :  { %3371 = vrot.lane.b32.xlu0 %v3264_v56, %s4057_s26 }
 0xbda   :  { %3369 = vrot.lane.b32.xlu1 %v3263_v57, %s4057_s26 }
 0xbdd   :  { %3367 = vrot.lane.b32.xlu0 %v3262_v58, %s4057_s26 }
 0xc40   :  { %v3233_v63 = vpop.xlane.xlu0 %3232 }
 0xc41   :  { %v3243_v4 = vmul.f32 0.03125, %v3233_v63 }
 0xc42   :  { %v3230_v2 = vpop.xlane.xlu1 %3229 }
 0xc43   :  { %v3242_v8 = vmul.f32 0.03125, %v3230_v2  ;;  %v3247_v18 = vmul.f32 %v3243_v4, %v3243_v4  ;;  %v3251_v28 = vsub.f32 %v4551_v50, %v3243_v4 }
 0xc44   :  { %v3238_v11 = vpop.xlane.xlu0 %3237 }
 0xc45   :  { %v3246_v13 = vmul.f32 %v3242_v8, %v3242_v8  ;;  %v3244_v15 = vmul.f32 0.03125, %v3238_v11  ;;  %v3250_v22 = vsub.f32 %v4554_v14, %v3242_v8 }
 0xc46   :  { %v3241_v17 = vpop.xlane.xlu1 %3240 }
 0xc47   :  { %v3248_v30 = vsub.f32 %v3244_v15, %v3246_v13  ;;  %v3245_v21 = vmul.f32 0.03125, %v3241_v17  ;;  %v3475_v15 = vld [vmem:[#allocation2 + $0x66] ss:$0 sm:$0xff] }
 0xc48   :  { %v3382_v19 = vpop.permute.xlu0 %3381 }
 0xc49   :  { %v3252_v23 = vadd.f32 1e-05, %v3248_v30  ;;  %v3249_v24 = vsub.f32 %v3245_v21, %v3247_v18  ;;  %3894 = vmatprep.subr.mxu1 %v3382_v19  ;;  %v3476_v21 = vld [vmem:[#allocation2 + $0x67] ss:$0 sm:$0xff] }
 0xc4a   :  { %v3380_v32 = vpop.permute.xlu1 %3379  ;;  %3895 = vmatpush3.msra.mxu1 %v3382_v19 }
 0xc4b   :  { %3996 = vrsqrt.f32 %v3252_v23  ;;  %v3253_v25 = vadd.f32 1e-05, %v3249_v24  ;;  %3896 = vmatprep.subr.mxu1 %v3380_v32 }
 0xc4c   :  { %3897 = vmatpush3.msra.mxu1 %v3380_v32  ;;  %v3376_v29 = vpop.permute.xlu0 %3375 }
 0xc4d   :  { %3998 = vrsqrt.f32 %v3253_v25 }
 0xc4e   :  { %v3378_v26 = vpop.permute.xlu1 %3377 }
 0xc4f   :  { %3898 = vmatprep.subr.mxu1 %v3378_v26 }
 0xc50   :  { %3899 = vmatpush3.msra.mxu1 %v3378_v26  ;;  %v3372_v12 = vpop.permute.xlu0 %3371 }
 0xc51   :  { %3900 = vmatprep.subr.mxu1 %v3376_v29 }
 0xc52   :  { %3901 = vmatpush3.msra.mxu1 %v3376_v29  ;;  %v3374_v10 = vpop.permute.xlu1 %3373 }
 0xc53   :  { %3902 = vmatprep.subr.mxu1 %v3374_v10 }
 0xc54   :  { %3903 = vmatpush3.msra.mxu1 %v3374_v10  ;;  %v3368_v47 = vpop.permute.xlu0 %3367 }
 0xc55   :  { %3904 = vmatprep.subr.mxu1 %v3372_v12 }
 0xc56   :  { %3905 = vmatpush3.msra.mxu1 %v3372_v12  ;;  %v3370_v49 = vpop.permute.xlu1 %3369 }
 0xc57   :  { %3906 = vmatprep.subr.mxu1 %v3370_v49 }
 0xc58   :  { %v3997_v0 = vpop.eup %3996  ;;  %3907 = vmatpush3.msra.mxu1 %v3370_v49 }
 0xc59   :  { %v3256_v33 = vmul.f32 %v3997_v0, %v3250_v22  ;;  %3908 = vmatprep.subr.mxu1 %v3368_v47 }
 0xc5a   :  { %v3999_v34 = vpop.eup %3998  ;;  %3909 = vmatpush3.msra.mxu1 %v3368_v47 }
 0xc5b   :  { %v3257_v36 = vmul.f32 %v3999_v34, %v3251_v28  ;;  %v3258_v37 = vmul.f32 %v3256_v33, %v3226_v27 }
 0xc5d   :  { %v3259_v9 = vmul.f32 %v3257_v36, %v3226_v27  ;;  %v3260_v39 = vadd.f32 %v3258_v37, %v3227_v35 }
 0xc5f   :  { %v3261_v1 = vadd.f32 %v3259_v9, %v3227_v35  ;;  %3891 = vmatprep.mubr.msk.f32.mxu0 %vm51_vm0, %v3260_v39 }
 0xc61   :  { %3892 = vmatmul.mubr.msk.f32.vlgmr.msra.gmra.mxu0 %vm51_vm0, %v3261_v1 }
 0xd21   :  { %v3893_v5 = vpop.f32.mrf.mxu0 }
 0xd22   :  { %v3345_v7 = vadd.f32 %v3893_v5, %v3266_v3 }
 0xd23   :  { %v3339_v16 = vpop.f32.mrf.mxu0 }
 0xd24   :  { %v3340_v46 = vadd.f32 %v3339_v16, %v3266_v3  ;;  %v3349_v40 = vmax.f32 %v3345_v7, 0.0 }
 0xd26   :  { %v3348_v48 = vmax.f32 %v3340_v46, 0.0 }
 0xd28   :  { %3910 = vmatprep.mubr.msk.f32.mxu1 %vm3391_vm5, %v3348_v48 }
 0xd29   :  { %3911 = vmatmul.mubr.msk.f32.vlgmr.msra.gmra.mxu1 %vm3391_vm5, %v3349_v40 }
 0xde9   :  { %v3912_v6 = vpop.f32.mrf.mxu1 }
 0xdea   :  { %v3470_v42 = vadd.f32 %v3912_v6, %v3358_v41 }
 0xdeb   :  { %v3464_v43 = vpop.f32.mrf.mxu1 }
 0xdec   :  { %v3474_v44 = vadd.f32 %v3470_v42, %v3261_v1  ;;  %v3465_v45 = vadd.f32 %v3464_v43, %v3358_v41 }
 0xdee   :  { %v3473_v50 = vadd.f32 %v3465_v45, %v3260_v39  ;;  %v3480_v38 = vsel %vm51_vm0, %v3474_v44, 0.0  ;;  %v3484_v52 = vmul.f32 %v3474_v44, %v3474_v44 }
 0xdef   :  { %3481 = vadd.xlane.f32.xlu0 %v3480_v38 }
 0xdf0   :  { %v3477_v14 = vsel %vm51_vm0, %v3473_v50, 0.0  ;;  %v3483_v51 = vmul.f32 %v3473_v50, %v3473_v50  ;;  %v3488_v54 = vsel %vm51_vm0, %v3484_v52, 0.0 }
 0xdf1   :  { %3478 = vadd.xlane.f32.xlu1 %v3477_v14 }
 0xdf2   :  { %v3485_v53 = vsel %vm51_vm0, %v3483_v51, 0.0 }
 0xdf3   :  { %3486 = vadd.xlane.f32.xlu0 %v3485_v53 }
 0xdf5   :  { %3489 = vadd.xlane.f32.xlu1 %v3488_v54 }
 0xe78   :  { %v3482_v31 = vpop.xlane.xlu0 %3481 }
 0xe79   :  { %v3492_v55 = vmul.f32 0.03125, %v3482_v31 }
 0xe7a   :  { %v3479_v20 = vpop.xlane.xlu1 %3478 }
 0xe7b   :  { %v3491_v56 = vmul.f32 0.03125, %v3479_v20  ;;  %v3496_v61 = vmul.f32 %v3492_v55, %v3492_v55  ;;  %v3500_v17 = vsub.f32 %v3474_v44, %v3492_v55 }
 0xe7c   :  { %v3487_v57 = vpop.xlane.xlu0 %3486 }
 0xe7d   :  { %v3495_v58 = vmul.f32 %v3491_v56, %v3491_v56  ;;  %v3493_v59 = vmul.f32 0.03125, %v3487_v57  ;;  %v3499_v11 = vsub.f32 %v3473_v50, %v3491_v56 }
 0xe7e   :  { %v3490_v60 = vpop.xlane.xlu1 %3489 }
 0xe7f   :  { %v3497_v62 = vsub.f32 %v3493_v59, %v3495_v58  ;;  %v3494_v63 = vmul.f32 0.03125, %v3490_v60 }
 0xe81   :  { %v3501_v2 = vadd.f32 1e-05, %v3497_v62  ;;  %v3498_v4 = vsub.f32 %v3494_v63, %v3496_v61 }
 0xe83   :  { %4000 = vrsqrt.f32 %v3501_v2  ;;  %v3502_v8 = vadd.f32 1e-05, %v3498_v4 }
 0xe85   :  { %4002 = vrsqrt.f32 %v3502_v8 }
 0xe90   :  { %v4001_v13 = vpop.eup %4000 }
 0xe91   :  { %v3505_v18 = vmul.f32 %v4001_v13, %v3499_v11 }
 0xe92   :  { %v4003_v30 = vpop.eup %4002 }
 0xe93   :  { %v3506_v23 = vmul.f32 %v4003_v30, %v3500_v17  ;;  %v3507_v24 = vmul.f32 %v3505_v18, %v3475_v15 }
 0xe95   :  { %v3508_v25 = vmul.f32 %v3506_v23, %v3475_v15  ;;  %v3509_v19 = vadd.f32 %v3507_v24, %v3476_v21 }
 0xe97   :  { %v3510_v32 = vadd.f32 %v3508_v25, %v3476_v21  ;;  %3511 = vst.msk [vmem:[#allocation5] sm:$0xff] %vm51_vm0, %v3509_v19 }
 0xe99   :  { %3512 = vst.msk [vmem:[#allocation5 + $0x8] sm:$0xff] %vm51_vm0, %v3510_v32 }
 0xe9a   :  { %4035 = shalt.err (!%p4032_p9)
}
 0xe9b   :  { %s4062_s5 = smov 128  }
 0xe9c   :  { %3524 = dma.vmem_to_hbm [thread:$0]  %s3519_s3, 256, %s4590_s2, [#allocation4], %s4062_s5, %s4062_s5, %s4058_s27  }
 0xe9d   :  { %4046 = dma.done.wait [#allocation4], 256  }
 0xe9e   :  { %4047 = vsyncadd [#allocation4], 4294967040 }
 0xe9f   :  { %3528 = vsyncpa [#allocation3], 1 }
 0xea0   :  { %3529 = vsyncpa [#allocation4], 1 }

</bundles_post_ra>
